<compile_context>
chip_gen: v7x
topology: tpu7x:2x2x1
jax: 0.10.0
libtpu: 0.0.40
codegen_flags: <defaults>
</compile_context>

<pallas_src>
import jax
import jax.numpy as jnp
from jax.experimental import pallas as pl
from jax.experimental.pallas import tpu as pltpu

EPS = 1e-5  # InstanceNorm2d default eps


def _up_conv_in_kernel(x_ref, v_ref, l_ref, s_ref, st_ref, o_ref):
    """One batch element per grid step.

    x_ref  : (1, Cin*h, w)        original image, channel-major rows
    v_ref  : (3, w, W)            column upsample+pad+shift operators (one per kw)
    l_ref  : (3, Cout*H, Cin*h)   conv weights folded with the row operators
    s_ref  : (Cout, Cout*H)       channel block-reduce matrix (rows -> channels)
    st_ref : (Cout*H, Cout)       channel broadcast matrix (channels -> rows)
    o_ref  : (1, Cout*H, W)       output, free-reshapes to NCHW in the wrapper
    """
    cout_h = o_ref.shape[1]
    W = o_ref.shape[2]
    c_out = s_ref.shape[0]
    H = cout_h // c_out
    inv_n = 1.0 / float(H * W)

    x2 = x_ref[0]                                              # (Cin*h, w) f32

    # Fused upsample + pad + 3x3 conv: three deep-K MXU matmuls.
    acc = jnp.zeros((cout_h, W), dtype=jnp.float32)
    for kw in range(3):
        ck = jnp.dot(x2, v_ref[kw],
                     preferred_element_type=jnp.float32)       # (Cin*h, W)
        acc = acc + jnp.dot(l_ref[kw], ck,
                            preferred_element_type=jnp.float32)  # (Cout*H, W)

    # Conv bias intentionally omitted: a per-channel constant is exactly cancelled
    # by the InstanceNorm mean subtraction below.

    # InstanceNorm2d(affine=False), single-pass stats (sum & sum of squares),
    # per-channel over all H*W positions (rows grouped in blocks of H).
    ch_sum = jnp.sum(
        jnp.dot(s_ref[...], acc, preferred_element_type=jnp.float32),
        axis=-1, keepdims=True)                                # (Cout, 1)
    ch_sq = jnp.sum(
        jnp.dot(s_ref[...], acc * acc, preferred_element_type=jnp.float32),
        axis=-1, keepdims=True)                                # (Cout, 1)
    mean = ch_sum * inv_n
    var = jnp.maximum(ch_sq * inv_n - mean * mean, 0.0)
    scale = jax.lax.rsqrt(var + EPS)                           # (Cout, 1)
    shift = -mean * scale                                      # (Cout, 1)

    # Broadcast per-channel scale/shift back to the (Cout*H, W) row layout.
    row_scale = jnp.dot(st_ref[...], jnp.broadcast_to(scale, (c_out, W)),
                        preferred_element_type=jnp.float32)    # (Cout*H, W)
    row_shift = jnp.dot(st_ref[...], jnp.broadcast_to(shift, (c_out, W)),
                        preferred_element_type=jnp.float32)    # (Cout*H, W)

    y = jnp.maximum(acc * row_scale + row_shift, 0.0)          # ReLU
    o_ref[0] = y.astype(o_ref.dtype)


def _build_operators(h, w, c_in, c_out, weight_oihw, dtype=jnp.float32):
    """Tiny constant operator matrices (built once per call in the wrapper)."""
    H, W = 2 * h, 2 * w
    k = jnp.arange(3)

    # Row operator R[kh, p, i] = 1 iff output row p, tap kh reads input row i
    # of the ORIGINAL image (upsample x2 + zero pad + shift folded together).
    p = jnp.arange(H)
    src_r = p[None, :] + k[:, None] - 1                        # (3, H)
    valid_r = (src_r >= 0) & (src_r < H)
    tgt_r = src_r // 2
    R = ((jnp.arange(h)[None, None, :] == tgt_r[:, :, None])
         & valid_r[:, :, None]).astype(dtype)                  # (3, H, h)

    # Column operator V[kw, j, q] = 1 iff output col q, tap kw reads input col j.
    q = jnp.arange(W)
    src_c = q[None, :] + k[:, None] - 1                        # (3, W)
    valid_c = (src_c >= 0) & (src_c < W)
    tgt_c = src_c // 2
    V = ((jnp.arange(w)[None, :, None] == tgt_c[:, None, :])
         & valid_c[:, None, :]).astype(dtype)                  # (3, w, W)

    # Fold the conv weights (OIHW) with the row operator:
    # L[kw, o*H + p, c*h + i] = sum_kh weight[o, c, kh, kw] * R[kh, p, i]
    L = jnp.einsum('ockw,kpi->wopci', weight_oihw.astype(dtype), R)
    L = L.reshape(3, c_out * H, c_in * h)

    # Channel block-reduce / broadcast matrices for InstanceNorm over (Cout*H, W).
    rows = jnp.arange(c_out * H)
    S = (jnp.arange(c_out)[:, None] == (rows[None, :] // H)).astype(dtype)  # (Cout, Cout*H)
    ST = S.T                                                                 # (Cout*H, Cout)
    return V, L, S, ST


@jax.jit
def up_conv_in_forward(x_nchw, weight_oihw, bias=None):
    """Forward pass of up_conv_IN.

    x_nchw      : (N, Cin, h, w)        float32
    weight_oihw : (Cout, Cin, 3, 3)     float32  (PyTorch Conv2d layout)
    bias        : (Cout,)               float32  (unused: cancelled by InstanceNorm)
    returns     : (N, Cout, 2h, 2w)     float32
    """
    del bias  # exactly cancelled by InstanceNorm2d(affine=False); kept for API compat.
    n, c_in, h, w = x_nchw.shape
    c_out = weight_oihw.shape[0]
    H, W = 2 * h, 2 * w

    V, L, S, ST = _build_operators(h, w, c_in, c_out, weight_oihw)

    # Free row-major merges only — nothing large is materialized in HBM.
    x2 = x_nchw.reshape(n, c_in * h, w)                        # (N, Cin*h, w)

    out2 = pl.pallas_call(
        _up_conv_in_kernel,
        out_shape=jax.ShapeDtypeStruct((n, c_out * H, W), jnp.float32),
        grid_spec=pltpu.PrefetchScalarGridSpec(
            num_scalar_prefetch=0,
            grid=(n,),
            in_specs=[
                pl.BlockSpec((1, c_in * h, w), lambda i: (i, 0, 0)),
                pl.BlockSpec((3, w, W), lambda i: (0, 0, 0)),
                pl.BlockSpec((3, c_out * H, c_in * h), lambda i: (0, 0, 0)),
                pl.BlockSpec((c_out, c_out * H), lambda i: (0, 0)),
                pl.BlockSpec((c_out * H, c_out), lambda i: (0, 0)),
            ],
            out_specs=pl.BlockSpec((1, c_out * H, W), lambda i: (i, 0, 0)),
        ),
        compiler_params=pltpu.CompilerParams(
            dimension_semantics=("parallel",),
            vmem_limit_bytes=32 * 1024 * 1024,
        ),
    )(x2, V, L, S, ST)

    return out2.reshape(n, c_out, H, W)                        # free reshape -> NCHW


def _reference_forward(x_nchw, weight_oihw, bias):
    """Pure-JAX reference (matches the PyTorch module semantics)."""
    x_up = jnp.repeat(jnp.repeat(x_nchw, 2, axis=2), 2, axis=3)
    y = jax.lax.conv_general_dilated(
        x_up, weight_oihw, window_strides=(1, 1), padding="SAME",
        dimension_numbers=("NCHW", "OIHW", "NCHW"))
    y = y + bias[None, :, None, None]
    mean = jnp.mean(y, axis=(2, 3), keepdims=True)
    var = jnp.mean((y - mean) ** 2, axis=(2, 3), keepdims=True)
    y = (y - mean) * jax.lax.rsqrt(var + EPS)
    return jnp.maximum(y, 0.0)


if __name__ == "__main__":
    # Small shapes consistent with the module: N=2, ch_in=4, ch_out=8, 16x16 spatial.
    N, CH_IN, CH_OUT, HS, WS = 2, 4, 8, 16, 16

    key = jax.random.PRNGKey(0)
    kx, kwt, kb = jax.random.split(key, 3)

    x = jax.random.normal(kx, (N, CH_IN, HS, WS), dtype=jnp.float32)
    # Conv2d(ch_in, ch_out, 3, bias=True) parameters in PyTorch OIHW layout.
    weight = 0.1 * jax.random.normal(kwt, (CH_OUT, CH_IN, 3, 3), dtype=jnp.float32)
    bias = 0.1 * jax.random.normal(kb, (CH_OUT,), dtype=jnp.float32)

    out = up_conv_in_forward(x, weight, bias)
    out = jax.block_until_ready(out)

    ref = _reference_forward(x, weight, bias)
    assert out.shape == (N, CH_OUT, 2 * HS, 2 * WS)
    max_err = float(jnp.max(jnp.abs(out - ref)))
    assert jnp.allclose(out, ref, atol=2e-3, rtol=2e-3), max_err

    print("KERNEL_OK")
</pallas_src>

<mosaic_0001>
module attributes {stable_mosaic.version = 11 : i64} {
  func.func @_up_conv_in_kernel(%arg0: i32, %arg1: memref<1x64x16xf32, #tpu.memory_space<vmem>>, %arg2: memref<3x16x32xf32, #tpu.memory_space<vmem>>, %arg3: memref<3x256x64xf32, #tpu.memory_space<vmem>>, %arg4: memref<8x256xf32, #tpu.memory_space<vmem>>, %arg5: memref<256x8xf32, #tpu.memory_space<vmem>>, %arg6: memref<1x256x32xf32, #tpu.memory_space<vmem>>) attributes {dimension_semantics = [#tpu.dimension_semantics<parallel>], iteration_bounds = array<i64: 2>, scalar_prefetch = 0 : i64, scratch_operands = 0 : i64, tpu.core_type = #tpu.core_type<tc>, window_params = [{transform_indices = @transform_0, window_bounds = array<i64: 1, 64, 16>}, {pipeline_mode = #tpu.pipeline_mode<synchronous>, transform_indices = @transform_1, window_bounds = array<i64: 3, 16, 32>}, {pipeline_mode = #tpu.pipeline_mode<synchronous>, transform_indices = @transform_2, window_bounds = array<i64: 3, 256, 64>}, {pipeline_mode = #tpu.pipeline_mode<synchronous>, transform_indices = @transform_3, window_bounds = array<i64: 8, 256>}, {pipeline_mode = #tpu.pipeline_mode<synchronous>, transform_indices = @transform_4, window_bounds = array<i64: 256, 8>}, {transform_indices = @transform_5, window_bounds = array<i64: 1, 256, 32>}]} {
    %c0 = arith.constant 0 : index
    %c0_0 = arith.constant 0 : index
    %c0_1 = arith.constant 0 : index
    %0 = vector.load %arg1[%c0, %c0_0, %c0_1] : memref<1x64x16xf32, #tpu.memory_space<vmem>>, vector<1x64x16xf32>
    %1 = vector.shape_cast %0 : vector<1x64x16xf32> to vector<64x16xf32>
    %cst = arith.constant 0.000000e+00 : f32
    %2 = vector.broadcast %cst : f32 to vector<256x32xf32>
    %c0_2 = arith.constant 0 : index
    %c0_3 = arith.constant 0 : index
    %c0_4 = arith.constant 0 : index
    %3 = vector.load %arg2[%c0_2, %c0_3, %c0_4] : memref<3x16x32xf32, #tpu.memory_space<vmem>>, vector<1x16x32xf32>
    %4 = vector.shape_cast %3 : vector<1x16x32xf32> to vector<16x32xf32>
    %cst_5 = arith.constant dense<0.000000e+00> : vector<64x32xf32>
    %5 = tpu.matmul %1, %4, %cst_5 {dimension_numbers = #tpu.dot_dimension_numbers<[1], [0], [0], [1], [0, 0, 1, 1], [], []>} : vector<64x16xf32>, vector<16x32xf32>, vector<64x32xf32> -> vector<64x32xf32>
    %c0_6 = arith.constant 0 : index
    %c0_7 = arith.constant 0 : index
    %c0_8 = arith.constant 0 : index
    %6 = vector.load %arg3[%c0_6, %c0_7, %c0_8] : memref<3x256x64xf32, #tpu.memory_space<vmem>>, vector<1x256x64xf32>
    %7 = vector.shape_cast %6 : vector<1x256x64xf32> to vector<256x64xf32>
    %cst_9 = arith.constant dense<0.000000e+00> : vector<256x32xf32>
    %8 = tpu.matmul %7, %5, %cst_9 {dimension_numbers = #tpu.dot_dimension_numbers<[1], [0], [0], [1], [0, 0, 1, 1], [], []>} : vector<256x64xf32>, vector<64x32xf32>, vector<256x32xf32> -> vector<256x32xf32>
    %9 = arith.addf %2, %8 : vector<256x32xf32>
    %c1 = arith.constant 1 : index
    %c0_10 = arith.constant 0 : index
    %c0_11 = arith.constant 0 : index
    %10 = vector.load %arg2[%c1, %c0_10, %c0_11] : memref<3x16x32xf32, #tpu.memory_space<vmem>>, vector<1x16x32xf32>
    %11 = vector.shape_cast %10 : vector<1x16x32xf32> to vector<16x32xf32>
    %cst_12 = arith.constant dense<0.000000e+00> : vector<64x32xf32>
    %12 = tpu.matmul %1, %11, %cst_12 {dimension_numbers = #tpu.dot_dimension_numbers<[1], [0], [0], [1], [0, 0, 1, 1], [], []>} : vector<64x16xf32>, vector<16x32xf32>, vector<64x32xf32> -> vector<64x32xf32>
    %c1_13 = arith.constant 1 : index
    %c0_14 = arith.constant 0 : index
    %c0_15 = arith.constant 0 : index
    %13 = vector.load %arg3[%c1_13, %c0_14, %c0_15] : memref<3x256x64xf32, #tpu.memory_space<vmem>>, vector<1x256x64xf32>
    %14 = vector.shape_cast %13 : vector<1x256x64xf32> to vector<256x64xf32>
    %cst_16 = arith.constant dense<0.000000e+00> : vector<256x32xf32>
    %15 = tpu.matmul %14, %12, %cst_16 {dimension_numbers = #tpu.dot_dimension_numbers<[1], [0], [0], [1], [0, 0, 1, 1], [], []>} : vector<256x64xf32>, vector<64x32xf32>, vector<256x32xf32> -> vector<256x32xf32>
    %16 = arith.addf %9, %15 : vector<256x32xf32>
    %c2 = arith.constant 2 : index
    %c0_17 = arith.constant 0 : index
    %c0_18 = arith.constant 0 : index
    %17 = vector.load %arg2[%c2, %c0_17, %c0_18] : memref<3x16x32xf32, #tpu.memory_space<vmem>>, vector<1x16x32xf32>
    %18 = vector.shape_cast %17 : vector<1x16x32xf32> to vector<16x32xf32>
    %cst_19 = arith.constant dense<0.000000e+00> : vector<64x32xf32>
    %19 = tpu.matmul %1, %18, %cst_19 {dimension_numbers = #tpu.dot_dimension_numbers<[1], [0], [0], [1], [0, 0, 1, 1], [], []>} : vector<64x16xf32>, vector<16x32xf32>, vector<64x32xf32> -> vector<64x32xf32>
    %c2_20 = arith.constant 2 : index
    %c0_21 = arith.constant 0 : index
    %c0_22 = arith.constant 0 : index
    %20 = vector.load %arg3[%c2_20, %c0_21, %c0_22] : memref<3x256x64xf32, #tpu.memory_space<vmem>>, vector<1x256x64xf32>
    %21 = vector.shape_cast %20 : vector<1x256x64xf32> to vector<256x64xf32>
    %cst_23 = arith.constant dense<0.000000e+00> : vector<256x32xf32>
    %22 = tpu.matmul %21, %19, %cst_23 {dimension_numbers = #tpu.dot_dimension_numbers<[1], [0], [0], [1], [0, 0, 1, 1], [], []>} : vector<256x64xf32>, vector<64x32xf32>, vector<256x32xf32> -> vector<256x32xf32>
    %23 = arith.addf %16, %22 : vector<256x32xf32>
    %c0_24 = arith.constant 0 : index
    %c0_25 = arith.constant 0 : index
    %24 = vector.load %arg4[%c0_24, %c0_25] : memref<8x256xf32, #tpu.memory_space<vmem>>, vector<8x256xf32>
    %cst_26 = arith.constant dense<0.000000e+00> : vector<8x32xf32>
    %25 = tpu.matmul %24, %23, %cst_26 {dimension_numbers = #tpu.dot_dimension_numbers<[1], [0], [0], [1], [0, 0, 1, 1], [], []>} : vector<8x256xf32>, vector<256x32xf32>, vector<8x32xf32> -> vector<8x32xf32>
    %cst_27 = arith.constant dense<0.000000e+00> : vector<8xf32>
    %26 = vector.multi_reduction <add>, %25, %cst_27 [1] : vector<8x32xf32> to vector<8xf32>
    %27 = vector.shape_cast %26 : vector<8xf32> to vector<8x1xf32>
    %c0_28 = arith.constant 0 : index
    %c0_29 = arith.constant 0 : index
    %28 = vector.load %arg4[%c0_28, %c0_29] : memref<8x256xf32, #tpu.memory_space<vmem>>, vector<8x256xf32>
    %29 = arith.mulf %23, %23 : vector<256x32xf32>
    %cst_30 = arith.constant dense<0.000000e+00> : vector<8x32xf32>
    %30 = tpu.matmul %28, %29, %cst_30 {dimension_numbers = #tpu.dot_dimension_numbers<[1], [0], [0], [1], [0, 0, 1, 1], [], []>} : vector<8x256xf32>, vector<256x32xf32>, vector<8x32xf32> -> vector<8x32xf32>
    %cst_31 = arith.constant dense<0.000000e+00> : vector<8xf32>
    %31 = vector.multi_reduction <add>, %30, %cst_31 [1] : vector<8x32xf32> to vector<8xf32>
    %32 = vector.shape_cast %31 : vector<8xf32> to vector<8x1xf32>
    %cst_32 = arith.constant 9.765625E-4 : f32
    %33 = vector.broadcast %cst_32 : f32 to vector<8x1xf32>
    %34 = arith.mulf %27, %33 : vector<8x1xf32>
    %cst_33 = arith.constant 9.765625E-4 : f32
    %35 = vector.broadcast %cst_33 : f32 to vector<8x1xf32>
    %36 = arith.mulf %32, %35 : vector<8x1xf32>
    %37 = arith.mulf %34, %34 : vector<8x1xf32>
    %38 = arith.subf %36, %37 : vector<8x1xf32>
    %cst_34 = arith.constant 0.000000e+00 : f32
    %39 = vector.broadcast %cst_34 : f32 to vector<8x1xf32>
    %40 = arith.maximumf %38, %39 : vector<8x1xf32>
    %cst_35 = arith.constant 9.99999974E-6 : f32
    %41 = vector.broadcast %cst_35 : f32 to vector<8x1xf32>
    %42 = arith.addf %40, %41 : vector<8x1xf32>
    %43 = math.rsqrt %42 : vector<8x1xf32>
    %cst_36 = arith.constant 0.000000e+00 : f32
    %44 = vector.broadcast %cst_36 : f32 to vector<8x1xf32>
    %45 = arith.subf %44, %34 : vector<8x1xf32>
    %46 = arith.mulf %45, %43 : vector<8x1xf32>
    %c0_37 = arith.constant 0 : index
    %c0_38 = arith.constant 0 : index
    %47 = vector.load %arg5[%c0_37, %c0_38] : memref<256x8xf32, #tpu.memory_space<vmem>>, vector<256x8xf32>
    %48 = vector.shape_cast %43 : vector<8x1xf32> to vector<8x1xf32>
    %49 = vector.broadcast %48 : vector<8x1xf32> to vector<8x32xf32>
    %cst_39 = arith.constant dense<0.000000e+00> : vector<256x32xf32>
    %50 = tpu.matmul %47, %49, %cst_39 {dimension_numbers = #tpu.dot_dimension_numbers<[1], [0], [0], [1], [0, 0, 1, 1], [], []>} : vector<256x8xf32>, vector<8x32xf32>, vector<256x32xf32> -> vector<256x32xf32>
    %c0_40 = arith.constant 0 : index
    %c0_41 = arith.constant 0 : index
    %51 = vector.load %arg5[%c0_40, %c0_41] : memref<256x8xf32, #tpu.memory_space<vmem>>, vector<256x8xf32>
    %52 = vector.shape_cast %46 : vector<8x1xf32> to vector<8x1xf32>
    %53 = vector.broadcast %52 : vector<8x1xf32> to vector<8x32xf32>
    %cst_42 = arith.constant dense<0.000000e+00> : vector<256x32xf32>
    %54 = tpu.matmul %51, %53, %cst_42 {dimension_numbers = #tpu.dot_dimension_numbers<[1], [0], [0], [1], [0, 0, 1, 1], [], []>} : vector<256x8xf32>, vector<8x32xf32>, vector<256x32xf32> -> vector<256x32xf32>
    %55 = arith.mulf %23, %50 : vector<256x32xf32>
    %56 = arith.addf %55, %54 : vector<256x32xf32>
    %cst_43 = arith.constant 0.000000e+00 : f32
    %57 = vector.broadcast %cst_43 : f32 to vector<256x32xf32>
    %58 = arith.maximumf %56, %57 : vector<256x32xf32>
    %c0_44 = arith.constant 0 : index
    %c0_45 = arith.constant 0 : index
    %c0_46 = arith.constant 0 : index
    %59 = vector.load %arg6[%c0_44, %c0_45, %c0_46] : memref<1x256x32xf32, #tpu.memory_space<vmem>>, vector<1x256x32xf32>
    %60 = vector.shape_cast %59 : vector<1x256x32xf32> to vector<256x32xf32>
    %61 = vector.shape_cast %58 : vector<256x32xf32> to vector<1x256x32xf32>
    tpu.vector_store %arg6[%c0_44, %c0_45, %c0_46], %61 {strides = array<i32>} : memref<1x256x32xf32, #tpu.memory_space<vmem>>, vector<1x256x32xf32>,
    return
  }
  func.func @transform_0(%arg0: i32) -> (i32, i32, i32) {
    %c0_i32 = arith.constant 0 : i32
    %c0_i32_0 = arith.constant 0 : i32
    %c0_i32_1 = arith.constant 0 : i32
    return %arg0, %c0_i32, %c0_i32_0 : i32, i32, i32
  }
  func.func @transform_1(%arg0: i32) -> (i32, i32, i32) {
    %c0_i32 = arith.constant 0 : i32
    %c0_i32_0 = arith.constant 0 : i32
    %c0_i32_1 = arith.constant 0 : i32
    %c0_i32_2 = arith.constant 0 : i32
    return %c0_i32, %c0_i32_0, %c0_i32_1 : i32, i32, i32
  }
  func.func @transform_2(%arg0: i32) -> (i32, i32, i32) {
    %c0_i32 = arith.constant 0 : i32
    %c0_i32_0 = arith.constant 0 : i32
    %c0_i32_1 = arith.constant 0 : i32
    %c0_i32_2 = arith.constant 0 : i32
    return %c0_i32, %c0_i32_0, %c0_i32_1 : i32, i32, i32
  }
  func.func @transform_3(%arg0: i32) -> (i32, i32) {
    %c0_i32 = arith.constant 0 : i32
    %c0_i32_0 = arith.constant 0 : i32
    %c0_i32_1 = arith.constant 0 : i32
    return %c0_i32, %c0_i32_0 : i32, i32
  }
  func.func @transform_4(%arg0: i32) -> (i32, i32) {
    %c0_i32 = arith.constant 0 : i32
    %c0_i32_0 = arith.constant 0 : i32
    %c0_i32_1 = arith.constant 0 : i32
    return %c0_i32, %c0_i32_0 : i32, i32
  }
  func.func @transform_5(%arg0: i32) -> (i32, i32, i32) {
    %c0_i32 = arith.constant 0 : i32
    %c0_i32_0 = arith.constant 0 : i32
    %c0_i32_1 = arith.constant 0 : i32
    return %arg0, %c0_i32, %c0_i32_0 : i32, i32, i32
  }
}

</mosaic_0001>

<bundles_post_ra>
// kernel: up_conv_in_forward.1
= control target key start
LH: loop header
LB: loop body
LE: loop exit
PB: predicated region body
PF: predicated region fallthrough
CT: control target
= control target key end

     0   :  { %10 = vsyncpa [#allocation3], 0  ;;  %s5038_s0 = inlined_call_operand.vmem [shape: f32[2,64,16], index: 0, kind: input, shape index: {}]   ;;  %s5039_s1 = inlined_call_operand.vmem [shape: f32[3,16,32], index: 1, kind: input, shape index: {}]   ;;  %s5040_s2 = inlined_call_operand.vmem [shape: f32[3,256,64], index: 2, kind: input, shape index: {}]   ;;  %s5041_s3 = inlined_call_operand.vmem [shape: f32[8,256], index: 3, kind: input, shape index: {}]   ;;  %s5042_s4 = inlined_call_operand.vmem [shape: f32[256,8], index: 4, kind: input, shape index: {}]   ;;  %s5043_s5 = inlined_call_operand.hbm [shape: f32[2,256,32], index: 5, kind: output, shape index: {}]  }
   0x1   :  { %12 = vsyncpa [#allocation3 + $0x1], 0  ;;  %s3866_s18 = smov 0   ;;  %s3868_s19 = smov 0  }
   0x2   :  { %s3870_s20 = smov 0   ;;  %s3872_s21 = smov 0  }
   0x3 LB: > { %s3887_s22 = sadd.s32 4294967295, %s3831_s21   ;;  %s2646_s23 = sadd.s32 4294967294, %s3831_s21   ;;  %s3831_s21 = sphi %s3872_s21, %s5058_s21   ;;  %s3827_s20 = sphi %s3870_s20, %s5057_s20   ;;  %s3823_s19 = sphi %s3868_s19, %s5056_s19   ;;  %s3819_s18 = sphi %s3866_s18, %s5055_s18  }
   0x4   : > { %s3891_s24 = sadd.s32 1, %s3831_s21   ;;  %s135_s25 = sadd.s32 1, %s3827_s20 }
   0x5   : > { %s132_s26 = ssub.s32 %s3831_s21, %s3891_s24  ;;  %p145_p0 = scmp.ne.s32.totalorder %s3827_s20, %s3823_s19 }
   0x6   : > { %p133_p1 = scmp.eq.s32.totalorder %s132_s26, 0  ;;  %p146_p2 = scmp.eq.s32.totalorder %s3887_s22, 1 }
   0x7   : > { %p151_p3 = scmp.ne.s32.totalorder %s3823_s19, %s3819_s18  ;;  %p152_p4 = scmp.eq.s32.totalorder %s2646_s23, 1 }
   0x8   : > { %s3902_s27 = scalar_select %p133_p1, %s3827_s20, %s135_s25  }
   0x9   : > { %p3904_p5 = por %p146_p2, %p145_p0  ;;  %p3908_p6 = por %p152_p4, %p151_p3 }
   0xa   : > { %p2649_p7 = scmp.ge.s32.totalorder %s3831_s21, 1  ;;  %p190_p8 = scmp.lt.s32.totalorder %s3831_s21, 3 }
   0xc   : > { %p191_p9 = pnand %p2649_p7, %p190_p8 }
   0xd   : > { %v2661_v0 = vld [vmem:[%s5039_s1 + $0x10] sm:$0xff] (!%p191_p9)  ;;  %v2662_v1 = vld [vmem:[%s5039_s1 + $0x18] sm:$0xff] (!%p191_p9)  ;;  %p218_p10 = scmp.lt.s32.totalorder (!%p191_p9), %s3887_s22, 1  ;;  %v231_v2 = vld [vmem:[%s5039_s1] sm:$0xff] (!%p191_p9)  ;;  %vm233_vm0 = vcmask (!%p191_p9), 130048   ;;  %vm536_vm1 = vcmask (!%p191_p9), 523264  }
   0xe   : > { %194 = sbr.rel (%p191_p9) target bundleno = 1432 (0x598), region = 40  ;;  %v3542_v3 = vpack.c.bf16 (!%p191_p9), %v2662_v1, %v2661_v0  ;;  %v232_v4 = vld [vmem:[%s5039_s1 + $0x8] sm:$0xff] (!%p191_p9)  ;;  %v2767_v5 = vld [vmem:[%s5039_s1 + $0x20] sm:$0xff] (!%p191_p9)  ;;  %v2673_v45 = vld [vmem:[%s5040_s2 + $0x110] sm:$0xff] (!%p191_p9)  ;;  %vm1745_vm2 = vcmask (!%p191_p9), 261120   ;;  %vm1895_vm3 = vcmask (!%p191_p9), 64512  }
   0xf   : > { %v2768_v6 = vld [vmem:[%s5039_s1 + $0x28] sm:$0xff] (!%p191_p9)  ;;  %v3538_v7 = vpack.c.bf16 (!%p191_p9), %v232_v4, %v231_v2  ;;  %v2671_v17 = vld [vmem:[%s5040_s2 + $0x100] sm:$0xff] (!%p191_p9)  ;;  %v2674_v48 = vld [vmem:[%s5040_s2 + $0x118] sm:$0xff] (!%p191_p9)  ;;  %s215_s10 = sand.u32 (!%p191_p9), 1, %s3823_s19   ;;  %s2911_s13 = sshll.u32 (!%p191_p9), %s3887_s22, 12 }
  0x10   : > { %v3578_v8 = vpack.c.bf16 (!%p191_p9), %v2768_v6, %v2767_v5  ;;  %3543 = vmatprep.subr.bf16.mxu1 (!%p191_p9), %v3542_v3  ;;  %v2672_v43 = vld [vmem:[%s5040_s2 + $0x108] sm:$0xff] (!%p191_p9)  ;;  %v2675_v50 = vld [vmem:[%s5040_s2 + $0x120] sm:$0xff] (!%p191_p9)  ;;  %v2677_v55 = vld [vmem:[%s5040_s2 + $0x130] sm:$0xff] (!%p191_p9)  ;;  %s2650_s11 = sshll.u32 (!%p191_p9), %s215_s10, 8  ;;  %s3833_s25 = smov (!%p191_p9), [#allocation2]  }
  0x11   : > { %3545 = vmatpush3.bf16.msra.mxu1 (!%p191_p9), %v3542_v3  ;;  %3539 = vmatprep.subr.bf16.mxu0 (!%p191_p9), %v3538_v7  ;;  %v2676_v53 = vld [vmem:[%s5040_s2 + $0x128] sm:$0xff] (!%p191_p9)  ;;  %v2678_v58 = vld [vmem:[%s5040_s2 + $0x138] sm:$0xff] (!%p191_p9)  ;;  %v2679_v60 = vld [vmem:[%s5040_s2 + $0x140] sm:$0xff] (!%p191_p9)  ;;  %s4890_s12 = scalar_lea.vmem (!%p191_p9), [#allocation2], %s2650_s11  ;;  %s3773_s26 = sshll.u32 (!%p191_p9), %s3833_s25, 4  ;;  %s3774_s26 = int_to_ptr.vmem [resolvable:$false] %s3773_s26 }
  0x12   : > { %3541 = vmatpush3.bf16.msra.mxu0 (!%p191_p9), %v3538_v7  ;;  %3579 = vmatprep.subr.bf16.mxu1 (!%p191_p9), %v3578_v8  ;;  %v2680_v62 = vld [vmem:[%s5040_s2 + $0x148] sm:$0xff] (!%p191_p9)  ;;  %v2681_v63 = vld [vmem:[%s5040_s2 + $0x150] sm:$0xff] (!%p191_p9)  ;;  %v2682_v0 = vld [vmem:[%s5040_s2 + $0x158] sm:$0xff] (!%p191_p9)  ;;  %s2584_s14 = sshll.u32 (!%p191_p9), %s4890_s12, 4  ;;  %s4989_s14 = int_to_ptr.vmem [resolvable:$true] %s2584_s14 }
  0x13   : > { %v2683_v1 = vld [vmem:[%s5040_s2 + $0x160] sm:$0xff] (!%p191_p9)  ;;  %v2684_v2 = vld [vmem:[%s5040_s2 + $0x168] sm:$0xff] (!%p191_p9)  ;;  %v2685_v3 = vld [vmem:[%s5040_s2 + $0x170] sm:$0xff] (!%p191_p9)  ;;  %p3776_p0 = scmp.lt.s32.totalorder (!%p191_p9), %s4989_s14, %s3774_s26 }
  0x14   : > { %v2686_v4 = vld [vmem:[%s5040_s2 + $0x178] sm:$0xff] (!%p191_p9)  ;;  %v2687_v5 = vld [vmem:[%s5040_s2 + $0x180] sm:$0xff] (!%p191_p9)  ;;  %v2688_v6 = vld [vmem:[%s5040_s2 + $0x188] sm:$0xff] (!%p191_p9) }
  0x15   : > { %s219_s17 = scalar_select %p218_p10, %s3887_s22, 1  ;;  %v2689_v7 = vld [vmem:[%s5040_s2 + $0x190] sm:$0xff] }
  0x16   : > { %s4997_s22 = scalar_lea.sflag [#allocation3], %s215_s10 }
  0x17   : > { %s2910_s23 = sshll.u32 %s219_s17, 6  ;;  %s4987_s17 = scalar_lea.hbm %s5043_s5, %s2911_s13 }
  0x18   : > { %s222_s30 = scalar_lea.vmem %s5038_s0, %s2910_s23  ;;  %s3769_s23 = scalar_lea.vmem %s4989_s14, 4096 }
  0x19   : > { %v223_v9 = vld [vmem:[%s222_s30] sm:$0xff]  ;;  %v224_v10 = vld [vmem:[%s222_s30 + $0x8] sm:$0xff]  ;;  %v225_v11 = vld [vmem:[%s222_s30 + $0x10] sm:$0xff]  ;;  %p3770_p11 = scmp.ne.s32.totalorder %s4989_s14, %s3769_s23 }
  0x1a   : > { %3218 = vmatprep.mubr.msk.f32.mxu1 %vm233_vm0, %v223_v9  ;;  %3202 = vmatprep.mubr.msk.f32.mxu0 %vm233_vm0, %v223_v9  ;;  %v226_v12 = vld [vmem:[%s222_s30 + $0x18] sm:$0xff]  ;;  %v227_v13 = vld [vmem:[%s222_s30 + $0x20] sm:$0xff]  ;;  %v228_v14 = vld [vmem:[%s222_s30 + $0x28] sm:$0xff] }
  0x1b   : > { %3219 = vmatmul.mubr.msk.f32.vlgmr.msra.gmra.mrb[0].mxu1 %vm233_vm0, %v224_v10  ;;  %3203 = vmatmul.mubr.msk.f32.vlgmr.msra.gmra.mrb[0].mxu0 %vm233_vm0, %v224_v10  ;;  %v229_v15 = vld [vmem:[%s222_s30 + $0x30] sm:$0xff]  ;;  %v230_v16 = vld [vmem:[%s222_s30 + $0x38] sm:$0xff]  ;;  %p3771_p12 = pnand %p3770_p11, %p3904_p5  ;;  %s3775_s30 = scalar_lea.vmem %s3774_s26, 8192 }
  0x1c   : > { %3221 = vmatprep.mubr.msk.f32.mxu1 %vm233_vm0, %v225_v11  ;;  %3205 = vmatprep.mubr.msk.f32.mxu0 %vm233_vm0, %v225_v11  ;;  %p3777_p1 = scmp.lt.s32.totalorder %s3775_s30, %s3769_s23 }
  0x1d   : > { %3581 = vmatpush3.bf16.msra.mxu1 %v3578_v8  ;;  %v2690_v8 = vld [vmem:[%s5040_s2 + $0x198] sm:$0xff]  ;;  %p3772_p13 = pneg %p3771_p12 }
  0x1e   : > { %p3778_p2 = por %p3777_p1, %p3776_p0 }
  0x1f   : > { %3222 = vmatmul.mubr.msk.f32.gmra.mrb[2].mxu1 %vm233_vm0, %v226_v12  ;;  %3206 = vmatmul.mubr.msk.f32.gmra.mrb[2].mxu0 %vm233_vm0, %v226_v12 }
  0x20   : > { %3224 = vmatprep.mubr.msk.f32.mxu1 %vm233_vm0, %v227_v13  ;;  %3208 = vmatprep.mubr.msk.f32.mxu0 %vm233_vm0, %v227_v13  ;;  %p3779_p3 = pnand %p3778_p2, %p3772_p13 }
  0x23   : > { %3225 = vmatmul.mubr.msk.f32.gmra.mrb[4].mxu1 %vm233_vm0, %v228_v14  ;;  %3209 = vmatmul.mubr.msk.f32.gmra.mrb[4].mxu0 %vm233_vm0, %v228_v14 }
  0x24   : > { %3227 = vmatprep.mubr.msk.f32.mxu1 %vm233_vm0, %v229_v15  ;;  %3211 = vmatprep.mubr.msk.f32.mxu0 %vm233_vm0, %v229_v15 }
  0x27   : > { %3228 = vmatmul.mubr.msk.f32.gmra.mrb[6].mxu1 %vm233_vm0, %v230_v16  ;;  %3212 = vmatmul.mubr.msk.f32.gmra.mrb[6].mxu0 %vm233_vm0, %v230_v16 }
  0x28   : > { %3362 = vmatprep.mubr.msk.f32.mxu1 %vm233_vm0, %v223_v9  ;;  %3246 = vmatprep.mubr.msk.f32.mxu0 %vm536_vm1, %v2671_v17  ;;  %v2691_v9 = vld [vmem:[%s5040_s2 + $0x1a0] sm:$0xff] }
  0x29   : > { %v2699_v17 = vld [vmem:[%s5040_s2 + $0x1e0] sm:$0xff] }
  0x2b   : > { %3363 = vmatmul.mubr.msk.f32.vlgmr.msra.gmra.mrb[8].mxu1 %vm233_vm0, %v224_v10  ;;  %v2692_v10 = vld [vmem:[%s5040_s2 + $0x1a8] sm:$0xff] }
  0x2c   : > { %3365 = vmatprep.mubr.msk.f32.mxu1 %vm233_vm0, %v225_v11  ;;  %v2693_v11 = vld [vmem:[%s5040_s2 + $0x1b0] sm:$0xff] }
  0x2f   : > { %3366 = vmatmul.mubr.msk.f32.gmra.mrb[10].mxu1 %vm233_vm0, %v226_v12  ;;  %v2694_v12 = vld [vmem:[%s5040_s2 + $0x1b8] sm:$0xff] }
  0x30   : > { %3368 = vmatprep.mubr.msk.f32.mxu1 %vm233_vm0, %v227_v13  ;;  %v2695_v13 = vld [vmem:[%s5040_s2 + $0x1c0] sm:$0xff] }
  0x33   : > { %3369 = vmatmul.mubr.msk.f32.gmra.mrb[12].mxu1 %vm233_vm0, %v228_v14  ;;  %v2696_v14 = vld [vmem:[%s5040_s2 + $0x1c8] sm:$0xff] }
  0x34   : > { %3371 = vmatprep.mubr.msk.f32.mxu1 %vm233_vm0, %v229_v15  ;;  %v2697_v15 = vld [vmem:[%s5040_s2 + $0x1d0] sm:$0xff] }
  0x37   : > { %3372 = vmatmul.mubr.msk.f32.gmra.mrb[14].mxu1 %vm233_vm0, %v230_v16  ;;  %v2698_v16 = vld [vmem:[%s5040_s2 + $0x1d8] sm:$0xff] }
  0xee   : > { %v3220_v18 = vpop.f32.mrb[0].mxu1  ;;  %v3204_v19 = vpop.f32.mrb[0].mxu0 }
  0xef   : > { %v464_v20 = vpop.f32.mrb[1].mxu1  ;;  %v324_v21 = vpop.f32.mrb[1].mxu0 }
  0xf0   : > { %v3546_v22 = vpack.c.bf16 %v3220_v18, %v464_v20  ;;  %v3562_v23 = vpack.c.bf16 %v3204_v19, %v324_v21  ;;  %v2700_v18 = vld [vmem:[%s5040_s2 + $0x1e8] sm:$0xff]  ;;  %v2701_v19 = vld [vmem:[%s5040_s2 + $0x1f0] sm:$0xff]  ;;  %v2702_v20 = vld [vmem:[%s5040_s2 + $0x1f8] sm:$0xff] }
  0xf1   : > { %v363_v21 = vld [vmem:[%s5040_s2] sm:$0xff] }
  0xf2   : > { %v3223_v24 = vpop.f32.mrb[2].mxu1  ;;  %3547 = vmatprep.subr.bf16.mxu0 %v3546_v22  ;;  %v3207_v25 = vpop.f32.mrb[2].mxu0 }
  0xf3   : > { %v474_v26 = vpop.f32.mrb[3].mxu1  ;;  %3549 = vmatpush3.bf16.msra.mxu0 %v3546_v22  ;;  %v334_v27 = vpop.f32.mrb[3].mxu0  ;;  %v364_v22 = vld [vmem:[%s5040_s2 + $0x8] sm:$0xff] }
  0xf4   : > { %v3550_v28 = vpack.c.bf16 %v3223_v24, %v474_v26  ;;  %v3566_v29 = vpack.c.bf16 %v3207_v25, %v334_v27  ;;  %v366_v24 = vld [vmem:[%s5040_s2 + $0x18] sm:$0xff]  ;;  %v367_v25 = vld [vmem:[%s5040_s2 + $0x20] sm:$0xff]  ;;  %v368_v26 = vld [vmem:[%s5040_s2 + $0x28] sm:$0xff] }
  0xf5   : > { %v369_v27 = vld [vmem:[%s5040_s2 + $0x30] sm:$0xff] }
  0xf6   : > { %v3226_v30 = vpop.f32.mrb[4].mxu1  ;;  %3551 = vmatprep.subr.bf16.mxu0 %v3550_v28  ;;  %v3210_v31 = vpop.f32.mrb[4].mxu0 }
  0xf7   : > { %v484_v32 = vpop.f32.mrb[5].mxu1  ;;  %3553 = vmatpush3.bf16.msra.mxu0 %v3550_v28  ;;  %v344_v33 = vpop.f32.mrb[5].mxu0  ;;  %v370_v28 = vld [vmem:[%s5040_s2 + $0x38] sm:$0xff] }
  0xf8   : > { %v3554_v34 = vpack.c.bf16 %v3226_v30, %v484_v32  ;;  %v3570_v35 = vpack.c.bf16 %v3210_v31, %v344_v33  ;;  %v372_v30 = vld [vmem:[%s5040_s2 + $0x48] sm:$0xff]  ;;  %v373_v31 = vld [vmem:[%s5040_s2 + $0x50] sm:$0xff]  ;;  %v374_v32 = vld [vmem:[%s5040_s2 + $0x58] sm:$0xff] }
  0xf9   : > { %v375_v33 = vld [vmem:[%s5040_s2 + $0x60] sm:$0xff] }
  0xfa   : > { %v3229_v36 = vpop.f32.mrb[6].mxu1  ;;  %3555 = vmatprep.subr.bf16.mxu0 %v3554_v34  ;;  %v3213_v37 = vpop.f32.mrb[6].mxu0 }
  0xfb   : > { %v494_v38 = vpop.f32.mrb[7].mxu1  ;;  %3557 = vmatpush3.bf16.msra.mxu0 %v3554_v34  ;;  %v354_v39 = vpop.f32.mrb[7].mxu0  ;;  %v376_v34 = vld [vmem:[%s5040_s2 + $0x68] sm:$0xff] }
  0xfc   : > { %v3558_v40 = vpack.c.bf16 %v3229_v36, %v494_v38  ;;  %v3574_v41 = vpack.c.bf16 %v3213_v37, %v354_v39  ;;  %v378_v36 = vld [vmem:[%s5040_s2 + $0x78] sm:$0xff]  ;;  %v379_v37 = vld [vmem:[%s5040_s2 + $0x80] sm:$0xff]  ;;  %v380_v38 = vld [vmem:[%s5040_s2 + $0x88] sm:$0xff] }
  0xfd   : > { %v381_v39 = vld [vmem:[%s5040_s2 + $0x90] sm:$0xff] }
  0xfe   : > { %3559 = vmatprep.subr.bf16.mxu0 %v3558_v40  ;;  %v3364_v42 = vpop.f32.mrb[8].mxu1 }
  0xff   : > { %3561 = vmatpush3.bf16.msra.mxu0 %v3558_v40  ;;  %v1248_v44 = vpop.f32.mrb[9].mxu1  ;;  %v382_v40 = vld [vmem:[%s5040_s2 + $0x98] sm:$0xff] }
 0x100   : > { %3563 = vmatprep.subr.bf16.mxu0 %v3562_v23  ;;  %v3971_v46 = vpack.c.bf16 %v3364_v42, %v1248_v44  ;;  %v384_v42 = vld [vmem:[%s5040_s2 + $0xa8] sm:$0xff]  ;;  %v386_v44 = vld [vmem:[%s5040_s2 + $0xb8] sm:$0xff] }
 0x102   : > { %3247 = vmatmul.mubr.msk.f32.vlgmr.msra.gmra.mrb[8].mxu0 %vm536_vm1, %v2672_v43  ;;  %v3367_v47 = vpop.f32.mrb[10].mxu1  ;;  %v385_v43 = vld [vmem:[%s5040_s2 + $0xb0] sm:$0xff] }
 0x103   : > { %3565 = vmatpush3.bf16.msra.mxu0 %v3562_v23  ;;  %3249 = vmatprep.mubr.msk.f32.mxu0 %vm536_vm1, %v2673_v45  ;;  %v1258_v49 = vpop.f32.mrb[11].mxu1  ;;  %v365_v23 = vld [vmem:[%s5040_s2 + $0x10] sm:$0xff]  ;;  %v387_v45 = vld [vmem:[%s5040_s2 + $0xc0] sm:$0xff] }
 0x104   : > { %3567 = vmatprep.subr.bf16.mxu0 %v3566_v29  ;;  %v3981_v51 = vpack.c.bf16 %v3367_v47, %v1258_v49  ;;  %v389_v47 = vld [vmem:[%s5040_s2 + $0xd0] sm:$0xff]  ;;  %v391_v49 = vld [vmem:[%s5040_s2 + $0xe0] sm:$0xff] }
 0x106   : > { %3250 = vmatmul.mubr.msk.f32.gmra.mrb[10].mxu0 %vm536_vm1, %v2674_v48  ;;  %v3370_v52 = vpop.f32.mrb[12].mxu1  ;;  %v390_v48 = vld [vmem:[%s5040_s2 + $0xd8] sm:$0xff] }
 0x107   : > { %3252 = vmatprep.mubr.msk.f32.mxu0 %vm536_vm1, %v2675_v50  ;;  %3569 = vmatpush3.bf16.msra.mxu0 %v3566_v29  ;;  %v1268_v54 = vpop.f32.mrb[13].mxu1  ;;  %v371_v29 = vld [vmem:[%s5040_s2 + $0x40] sm:$0xff]  ;;  %v392_v50 = vld [vmem:[%s5040_s2 + $0xe8] sm:$0xff] }
 0x108   : > { %3571 = vmatprep.subr.bf16.mxu0 %v3570_v35  ;;  %v3991_v56 = vpack.c.bf16 %v3370_v52, %v1268_v54  ;;  %v394_v52 = vld [vmem:[%s5040_s2 + $0xf8] sm:$0xff]  ;;  %v2778_v54 = vld [vmem:[%s5040_s2 + $0x208] sm:$0xff] }
 0x10a   : > { %3253 = vmatmul.mubr.msk.f32.gmra.mrb[12].mxu0 %vm536_vm1, %v2676_v53  ;;  %v3373_v57 = vpop.f32.mrb[14].mxu1  ;;  %v2777_v53 = vld [vmem:[%s5040_s2 + $0x200] sm:$0xff] }
 0x10b   : > { %3255 = vmatprep.mubr.msk.f32.mxu0 %vm536_vm1, %v2677_v55  ;;  %3573 = vmatpush3.bf16.msra.mxu0 %v3570_v35  ;;  %v1278_v59 = vpop.f32.mrb[15].mxu1  ;;  %v377_v35 = vld [vmem:[%s5040_s2 + $0x70] sm:$0xff] }
 0x10c   : > { %3575 = vmatprep.subr.bf16.mxu0 %v3574_v41  ;;  %v4001_v61 = vpack.c.bf16 %v3373_v57, %v1278_v59  ;;  %v2779_v55 = vld [vmem:[%s5040_s2 + $0x210] sm:$0xff]  ;;  %v2781_v57 = vld [vmem:[%s5040_s2 + $0x220] sm:$0xff] }
 0x10d   : > { %v2783_v59 = vld [vmem:[%s5040_s2 + $0x230] sm:$0xff] }
 0x10e   : > { %3256 = vmatmul.mubr.msk.f32.gmra.mrb[14].mxu0 %vm536_vm1, %v2678_v58  ;;  %v2782_v58 = vld [vmem:[%s5040_s2 + $0x228] sm:$0xff] }
 0x10f   : > { %3258 = vmatprep.mubr.msk.f32.mxu0 %vm536_vm1, %v2679_v60  ;;  %3577 = vmatpush3.bf16.msra.mxu0 %v3574_v41  ;;  %v383_v41 = vld [vmem:[%s5040_s2 + $0xa0] sm:$0xff]  ;;  %v2784_v60 = vld [vmem:[%s5040_s2 + $0x238] sm:$0xff] }
 0x110   : > { %3583 = vmatprep.subr.bf16.mxu0 %v3971_v46 }
 0x112   : > { %3259 = vmatmul.mubr.msk.f32.gmra.mrb[16].mxu0 %vm536_vm1, %v2680_v62  ;;  %v2786_v62 = vld [vmem:[%s5040_s2 + $0x248] sm:$0xff] }
 0x113   : > { %3261 = vmatprep.mubr.msk.f32.mxu0 %vm536_vm1, %v2681_v63  ;;  %v2787_v63 = vld [vmem:[%s5040_s2 + $0x250] sm:$0xff] }
 0x116   : > { %3262 = vmatmul.mubr.msk.f32.gmra.mrb[18].mxu0 %vm536_vm1, %v2682_v0  ;;  %v2788_v0 = vld [vmem:[%s5040_s2 + $0x258] sm:$0xff] }
 0x117   : > { %3264 = vmatprep.mubr.msk.f32.mxu0 %vm536_vm1, %v2683_v1  ;;  %v2789_v1 = vld [vmem:[%s5040_s2 + $0x260] sm:$0xff] }
 0x11a   : > { %3265 = vmatmul.mubr.msk.f32.gmra.mrb[20].mxu0 %vm536_vm1, %v2684_v2  ;;  %v2790_v2 = vld [vmem:[%s5040_s2 + $0x268] sm:$0xff] }
 0x11b   : > { %3267 = vmatprep.mubr.msk.f32.mxu0 %vm536_vm1, %v2685_v3  ;;  %v2791_v3 = vld [vmem:[%s5040_s2 + $0x270] sm:$0xff] }
 0x11e   : > { %3268 = vmatmul.mubr.msk.f32.gmra.mrb[22].mxu0 %vm536_vm1, %v2686_v4  ;;  %v2792_v4 = vld [vmem:[%s5040_s2 + $0x278] sm:$0xff] }
 0x11f   : > { %3270 = vmatprep.mubr.msk.f32.mxu0 %vm536_vm1, %v2687_v5  ;;  %v2793_v5 = vld [vmem:[%s5040_s2 + $0x280] sm:$0xff] }
 0x122   : > { %3271 = vmatmul.mubr.msk.f32.gmra.mrb[24].mxu0 %vm536_vm1, %v2688_v6  ;;  %v2794_v6 = vld [vmem:[%s5040_s2 + $0x288] sm:$0xff] }
 0x123   : > { %3273 = vmatprep.mubr.msk.f32.mxu0 %vm536_vm1, %v2689_v7  ;;  %v2795_v7 = vld [vmem:[%s5040_s2 + $0x290] sm:$0xff] }
 0x126   : > { %3274 = vmatmul.mubr.msk.f32.gmra.mrb[26].mxu0 %vm536_vm1, %v2690_v8  ;;  %v2796_v8 = vld [vmem:[%s5040_s2 + $0x298] sm:$0xff] }
 0x127   : > { %3276 = vmatprep.mubr.msk.f32.mxu0 %vm536_vm1, %v2691_v9  ;;  %v2797_v9 = vld [vmem:[%s5040_s2 + $0x2a0] sm:$0xff] }
 0x12a   : > { %3277 = vmatmul.mubr.msk.f32.gmra.mrb[28].mxu0 %vm536_vm1, %v2692_v10  ;;  %v2798_v10 = vld [vmem:[%s5040_s2 + $0x2a8] sm:$0xff] }
 0x12b   : > { %3279 = vmatprep.mubr.msk.f32.mxu0 %vm536_vm1, %v2693_v11  ;;  %v2799_v11 = vld [vmem:[%s5040_s2 + $0x2b0] sm:$0xff] }
 0x12e   : > { %3280 = vmatmul.mubr.msk.f32.gmra.mrb[30].mxu0 %vm536_vm1, %v2694_v12  ;;  %v2800_v12 = vld [vmem:[%s5040_s2 + $0x2b8] sm:$0xff] }
 0x12f   : > { %3282 = vmatprep.mubr.msk.f32.mxu0 %vm536_vm1, %v2695_v13  ;;  %v2801_v13 = vld [vmem:[%s5040_s2 + $0x2c0] sm:$0xff] }
 0x132   : > { %3283 = vmatmul.mubr.msk.f32.gmra.mrb[32].mxu0 %vm536_vm1, %v2696_v14  ;;  %v2802_v14 = vld [vmem:[%s5040_s2 + $0x2c8] sm:$0xff] }
 0x133   : > { %3285 = vmatprep.mubr.msk.f32.mxu0 %vm536_vm1, %v2697_v15  ;;  %v2803_v15 = vld [vmem:[%s5040_s2 + $0x2d0] sm:$0xff] }
 0x136   : > { %3286 = vmatmul.mubr.msk.f32.gmra.mrb[34].mxu0 %vm536_vm1, %v2698_v16  ;;  %v2804_v16 = vld [vmem:[%s5040_s2 + $0x2d8] sm:$0xff] }
 0x137   : > { %3288 = vmatprep.mubr.msk.f32.mxu0 %vm536_vm1, %v2699_v17  ;;  %v2805_v17 = vld [vmem:[%s5040_s2 + $0x2e0] sm:$0xff] }
 0x13a   : > { %3289 = vmatmul.mubr.msk.f32.gmra.mrb[36].mxu0 %vm536_vm1, %v2700_v18  ;;  %v2806_v18 = vld [vmem:[%s5040_s2 + $0x2e8] sm:$0xff] }
 0x13b   : > { %3291 = vmatprep.mubr.msk.f32.mxu0 %vm536_vm1, %v2701_v19  ;;  %v2807_v19 = vld [vmem:[%s5040_s2 + $0x2f0] sm:$0xff] }
 0x13e   : > { %3292 = vmatmul.mubr.msk.f32.gmra.mrb[38].mxu0 %vm536_vm1, %v2702_v20  ;;  %v2808_v20 = vld [vmem:[%s5040_s2 + $0x2f8] sm:$0xff] }
 0x13f   : > { %3310 = vmatprep.mubr.msk.f32.mxu0 %vm536_vm1, %v363_v21  ;;  %v4364_v21 = vld [vmem:[%s5041_s3 + $0x8] sm:$0xff] }
 0x140   : > { %1739 = vmatprep.mubr.f32.mxu1 %v4364_v21 }
 0x142   : > { %3311 = vmatmul.mubr.msk.f32.vlgmr.msra.gmra.mrb[8].mxu0 %vm536_vm1, %v364_v22 }
 0x143   : > { %3585 = vmatpush3.bf16.msra.mxu0 %v3971_v46  ;;  %3313 = vmatprep.mubr.msk.f32.mxu0 %vm536_vm1, %v365_v23  ;;  %v388_v46 = vld [vmem:[%s5040_s2 + $0xc8] sm:$0xff] }
 0x144   : > { %3587 = vmatprep.subr.bf16.mxu0 %v3981_v51 }
 0x146   : > { %3314 = vmatmul.mubr.msk.f32.gmra.mrb[10].mxu0 %vm536_vm1, %v366_v24 }
 0x147   : > { %3316 = vmatprep.mubr.msk.f32.mxu0 %vm536_vm1, %v367_v25  ;;  %3589 = vmatpush3.bf16.msra.mxu0 %v3981_v51  ;;  %v393_v51 = vld [vmem:[%s5040_s2 + $0xf0] sm:$0xff] }
 0x148   : > { %3591 = vmatprep.subr.bf16.mxu0 %v3991_v56 }
 0x14a   : > { %3317 = vmatmul.mubr.msk.f32.gmra.mrb[12].mxu0 %vm536_vm1, %v368_v26 }
 0x14b   : > { %3319 = vmatprep.mubr.msk.f32.mxu0 %vm536_vm1, %v369_v27  ;;  %3593 = vmatpush3.bf16.msra.mxu0 %v3991_v56  ;;  %v2780_v56 = vld [vmem:[%s5040_s2 + $0x218] sm:$0xff] }
 0x14c   : > { %3595 = vmatprep.subr.bf16.mxu0 %v4001_v61 }
 0x14e   : > { %3320 = vmatmul.mubr.msk.f32.gmra.mrb[14].mxu0 %vm536_vm1, %v370_v28 }
 0x14f   : > { %3322 = vmatprep.mubr.msk.f32.mxu0 %vm536_vm1, %v371_v29  ;;  %3597 = vmatpush3.bf16.msra.mxu0 %v4001_v61  ;;  %v2785_v61 = vld [vmem:[%s5040_s2 + $0x240] sm:$0xff] }
 0x152   : > { %3323 = vmatmul.mubr.msk.f32.gmra.mrb[16].mxu0 %vm536_vm1, %v372_v30 }
 0x153   : > { %3325 = vmatprep.mubr.msk.f32.mxu0 %vm536_vm1, %v373_v31 }
 0x156   : > { %3326 = vmatmul.mubr.msk.f32.gmra.mrb[18].mxu0 %vm536_vm1, %v374_v32 }
 0x157   : > { %3328 = vmatprep.mubr.msk.f32.mxu0 %vm536_vm1, %v375_v33 }
 0x15a   : > { %3329 = vmatmul.mubr.msk.f32.gmra.mrb[20].mxu0 %vm536_vm1, %v376_v34 }
 0x15b   : > { %3331 = vmatprep.mubr.msk.f32.mxu0 %vm536_vm1, %v377_v35 }
 0x15e   : > { %3332 = vmatmul.mubr.msk.f32.gmra.mrb[22].mxu0 %vm536_vm1, %v378_v36 }
 0x15f   : > { %3334 = vmatprep.mubr.msk.f32.mxu0 %vm536_vm1, %v379_v37 }
 0x162   : > { %3335 = vmatmul.mubr.msk.f32.gmra.mrb[24].mxu0 %vm536_vm1, %v380_v38 }
 0x163   : > { %3337 = vmatprep.mubr.msk.f32.mxu0 %vm536_vm1, %v381_v39 }
 0x166   : > { %3338 = vmatmul.mubr.msk.f32.gmra.mrb[26].mxu0 %vm536_vm1, %v382_v40 }
 0x167   : > { %3340 = vmatprep.mubr.msk.f32.mxu0 %vm536_vm1, %v383_v41 }
 0x16a   : > { %3341 = vmatmul.mubr.msk.f32.gmra.mrb[28].mxu0 %vm536_vm1, %v384_v42 }
 0x16b   : > { %3343 = vmatprep.mubr.msk.f32.mxu0 %vm536_vm1, %v385_v43 }
 0x16e   : > { %3344 = vmatmul.mubr.msk.f32.gmra.mrb[30].mxu0 %vm536_vm1, %v386_v44 }
 0x16f   : > { %3346 = vmatprep.mubr.msk.f32.mxu0 %vm536_vm1, %v387_v45 }
 0x172   : > { %3347 = vmatmul.mubr.msk.f32.gmra.mrb[32].mxu0 %vm536_vm1, %v388_v46 }
 0x173   : > { %3349 = vmatprep.mubr.msk.f32.mxu0 %vm536_vm1, %v389_v47 }
 0x176   : > { %3350 = vmatmul.mubr.msk.f32.gmra.mrb[34].mxu0 %vm536_vm1, %v390_v48 }
 0x177   : > { %3352 = vmatprep.mubr.msk.f32.mxu0 %vm536_vm1, %v391_v49 }
 0x17a   : > { %3353 = vmatmul.mubr.msk.f32.gmra.mrb[36].mxu0 %vm536_vm1, %v392_v50 }
 0x17b   : > { %3355 = vmatprep.mubr.msk.f32.mxu0 %vm536_vm1, %v393_v51 }
 0x17e   : > { %3356 = vmatmul.mubr.msk.f32.gmra.mrb[38].mxu0 %vm536_vm1, %v394_v52 }
 0x17f   : > { %3390 = vmatprep.mubr.msk.f32.mxu0 %vm536_vm1, %v2777_v53 }
 0x182   : > { %3391 = vmatmul.mubr.msk.f32.vlgmr.msra.gmra.mrb[8].mxu0 %vm536_vm1, %v2778_v54 }
 0x183   : > { %3393 = vmatprep.mubr.msk.f32.mxu0 %vm536_vm1, %v2779_v55 }
 0x186   : > { %3394 = vmatmul.mubr.msk.f32.gmra.mrb[10].mxu0 %vm536_vm1, %v2780_v56 }
 0x187   : > { %3396 = vmatprep.mubr.msk.f32.mxu0 %vm536_vm1, %v2781_v57 }
 0x18a   : > { %3397 = vmatmul.mubr.msk.f32.gmra.mrb[12].mxu0 %vm536_vm1, %v2782_v58 }
 0x18b   : > { %3399 = vmatprep.mubr.msk.f32.mxu0 %vm536_vm1, %v2783_v59 }
 0x18e   : > { %3400 = vmatmul.mubr.msk.f32.gmra.mrb[14].mxu0 %vm536_vm1, %v2784_v60 }
 0x18f   : > { %3402 = vmatprep.mubr.msk.f32.mxu0 %vm536_vm1, %v2785_v61 }
 0x192   : > { %3403 = vmatmul.mubr.msk.f32.gmra.mrb[16].mxu0 %vm536_vm1, %v2786_v62 }
 0x193   : > { %3405 = vmatprep.mubr.msk.f32.mxu0 %vm536_vm1, %v2787_v63 }
 0x196   : > { %3406 = vmatmul.mubr.msk.f32.gmra.mrb[18].mxu0 %vm536_vm1, %v2788_v0 }
 0x197   : > { %3408 = vmatprep.mubr.msk.f32.mxu0 %vm536_vm1, %v2789_v1 }
 0x19a   : > { %3409 = vmatmul.mubr.msk.f32.gmra.mrb[20].mxu0 %vm536_vm1, %v2790_v2 }
 0x19b   : > { %3411 = vmatprep.mubr.msk.f32.mxu0 %vm536_vm1, %v2791_v3 }
 0x19e   : > { %3412 = vmatmul.mubr.msk.f32.gmra.mrb[22].mxu0 %vm536_vm1, %v2792_v4 }
 0x19f   : > { %3414 = vmatprep.mubr.msk.f32.mxu0 %vm536_vm1, %v2793_v5 }
 0x1a2   : > { %3415 = vmatmul.mubr.msk.f32.gmra.mrb[24].mxu0 %vm536_vm1, %v2794_v6 }
 0x1a3   : > { %3417 = vmatprep.mubr.msk.f32.mxu0 %vm536_vm1, %v2795_v7 }
 0x1a6   : > { %3418 = vmatmul.mubr.msk.f32.gmra.mrb[26].mxu0 %vm536_vm1, %v2796_v8 }
 0x1a7   : > { %3420 = vmatprep.mubr.msk.f32.mxu0 %vm536_vm1, %v2797_v9 }
 0x1aa   : > { %3421 = vmatmul.mubr.msk.f32.gmra.mrb[28].mxu0 %vm536_vm1, %v2798_v10 }
 0x1ab   : > { %3423 = vmatprep.mubr.msk.f32.mxu0 %vm536_vm1, %v2799_v11 }
 0x1ae   : > { %3424 = vmatmul.mubr.msk.f32.gmra.mrb[30].mxu0 %vm536_vm1, %v2800_v12 }
 0x1af   : > { %3426 = vmatprep.mubr.msk.f32.mxu0 %vm536_vm1, %v2801_v13 }
 0x1b2   : > { %3427 = vmatmul.mubr.msk.f32.gmra.mrb[32].mxu0 %vm536_vm1, %v2802_v14 }
 0x1b3   : > { %3429 = vmatprep.mubr.msk.f32.mxu0 %vm536_vm1, %v2803_v15 }
 0x1b6   : > { %3430 = vmatmul.mubr.msk.f32.gmra.mrb[34].mxu0 %vm536_vm1, %v2804_v16 }
 0x1b7   : > { %3432 = vmatprep.mubr.msk.f32.mxu0 %vm536_vm1, %v2805_v17 }
 0x1ba   : > { %3433 = vmatmul.mubr.msk.f32.gmra.mrb[36].mxu0 %vm536_vm1, %v2806_v18 }
 0x1bb   : > { %3435 = vmatprep.mubr.msk.f32.mxu0 %vm536_vm1, %v2807_v19 }
 0x1be   : > { %3436 = vmatmul.mubr.msk.f32.gmra.mrb[38].mxu0 %vm536_vm1, %v2808_v20 }
 0x255   : > { %v4367_v22 = vpop.f32.mrb[8].mxu0 }
 0x256   : > { %v4371_v23 = vmul.f32 %v4367_v22, %v4367_v22  ;;  %v4373_v24 = vpop.f32.mrb[9].mxu0 }
 0x257   : > { %v3600_v25 = vpack.c.bf16 %v4367_v22, %v4373_v24  ;;  %v4379_v26 = vmul.f32 %v4373_v24, %v4373_v24 }
 0x259   : > { %v4383_v28 = vpop.f32.mrb[10].mxu0 }
 0x25a   : > { %v4387_v29 = vmul.f32 %v4383_v28, %v4383_v28  ;;  %v4389_v30 = vpop.f32.mrb[11].mxu0 }
 0x25b   : > { %v3604_v31 = vpack.c.bf16 %v4383_v28, %v4389_v30  ;;  %v4395_v32 = vmul.f32 %v4389_v30, %v4389_v30 }
 0x25d   : > { %v4399_v34 = vpop.f32.mrb[12].mxu0 }
 0x25e   : > { %v4403_v35 = vmul.f32 %v4399_v34, %v4399_v34  ;;  %v4405_v36 = vpop.f32.mrb[13].mxu0 }
 0x25f   : > { %v3608_v37 = vpack.c.bf16 %v4399_v34, %v4405_v36  ;;  %v4411_v38 = vmul.f32 %v4405_v36, %v4405_v36 }
 0x261   : > { %v4415_v40 = vpop.f32.mrb[14].mxu0 }
 0x262   : > { %v4419_v41 = vmul.f32 %v4415_v40, %v4415_v40  ;;  %v4421_v42 = vpop.f32.mrb[15].mxu0 }
 0x263   : > { %v3612_v43 = vpack.c.bf16 %v4415_v40, %v4421_v42  ;;  %v4427_v44 = vmul.f32 %v4421_v42, %v4421_v42 }
 0x265   : > { %v4431_v46 = vpop.f32.mrb[16].mxu0 }
 0x266   : > { %v4435_v47 = vmul.f32 %v4431_v46, %v4431_v46  ;;  %v4437_v48 = vpop.f32.mrb[17].mxu0 }
 0x267   : > { %v3616_v49 = vpack.c.bf16 %v4431_v46, %v4437_v48  ;;  %v4443_v50 = vmul.f32 %v4437_v48, %v4437_v48 }
 0x269   : > { %v4447_v52 = vpop.f32.mrb[18].mxu0 }
 0x26a   : > { %v4451_v53 = vmul.f32 %v4447_v52, %v4447_v52  ;;  %v4453_v54 = vpop.f32.mrb[19].mxu0 }
 0x26b   : > { %v3620_v55 = vpack.c.bf16 %v4447_v52, %v4453_v54  ;;  %v4459_v56 = vmul.f32 %v4453_v54, %v4453_v54 }
 0x26d   : > { %v4463_v58 = vpop.f32.mrb[20].mxu0 }
 0x26e   : > { %v4467_v59 = vmul.f32 %v4463_v58, %v4463_v58  ;;  %v4469_v60 = vpop.f32.mrb[21].mxu0 }
 0x26f   : > { %v3624_v61 = vpack.c.bf16 %v4463_v58, %v4469_v60  ;;  %v4475_v62 = vmul.f32 %v4469_v60, %v4469_v60 }
 0x271   : > { %v4479_v0 = vpop.f32.mrb[22].mxu0 }
 0x272   : > { %v4483_v1 = vmul.f32 %v4479_v0, %v4479_v0  ;;  %v4485_v2 = vpop.f32.mrb[23].mxu0 }
 0x273   : > { %v4491_v4 = vmul.f32 %v4485_v2, %v4485_v2 }
 0x275   : > { %v4495_v6 = vpop.f32.mrb[24].mxu0 }
 0x276   : > { %v4499_v7 = vmul.f32 %v4495_v6, %v4495_v6  ;;  %v4501_v8 = vpop.f32.mrb[25].mxu0 }
 0x277   : > { %v3598_v9 = vpack.c.bf16 %v4495_v6, %v4501_v8  ;;  %v1765_v10 = vmul.f32 %v4501_v8, %v4501_v8 }
 0x279   : > { %v4507_v11 = vpop.f32.mrb[26].mxu0  ;;  %3599 = vmatprep.subr.bf16.mxu1 %v3598_v9  ;;  %v3630_v12 = vpack.c.bf16 %v4499_v7, %v1765_v10 }
 0x27a   : > { %v1768_v13 = vmul.f32 %v4507_v11, %v4507_v11  ;;  %v4512_v14 = vpop.f32.mrb[27].mxu0  ;;  %3601 = vmatpush3.bf16.msra.mxu1 %v3600_v25 }
 0x27b   : > { %v3602_v15 = vpack.c.bf16 %v4507_v11, %v4512_v14  ;;  %v1767_v16 = vmul.f32 %v4512_v14, %v4512_v14 }
 0x27d   : > { %v4518_v17 = vpop.f32.mrb[28].mxu0  ;;  %3603 = vmatprep.subr.bf16.mxu1 %v3602_v15  ;;  %v3634_v18 = vpack.c.bf16 %v1768_v13, %v1767_v16 }
 0x27e   : > { %v1770_v19 = vmul.f32 %v4518_v17, %v4518_v17  ;;  %v4522_v20 = vpop.f32.mrb[29].mxu0  ;;  %3605 = vmatpush3.bf16.msra.mxu1 %v3604_v31 }
 0x27f   : > { %v3606_v7 = vpack.c.bf16 %v4518_v17, %v4522_v20  ;;  %v1769_v25 = vmul.f32 %v4522_v20, %v4522_v20 }
 0x281   : > { %v4528_v9 = vpop.f32.mrb[30].mxu0  ;;  %3607 = vmatprep.subr.bf16.mxu1 %v3606_v7  ;;  %v3638_v10 = vpack.c.bf16 %v1770_v19, %v1769_v25 }
 0x282   : > { %v1772_v15 = vmul.f32 %v4528_v9, %v4528_v9  ;;  %v4532_v13 = vpop.f32.mrb[31].mxu0  ;;  %3609 = vmatpush3.bf16.msra.mxu1 %v3608_v37 }
 0x283   : > { %v3610_v16 = vpack.c.bf16 %v4528_v9, %v4532_v13  ;;  %v1771_v31 = vmul.f32 %v4532_v13, %v4532_v13 }
 0x285   : > { %v4538_v5 = vpop.f32.mrb[32].mxu0  ;;  %3611 = vmatprep.subr.bf16.mxu1 %v3610_v16  ;;  %v3642_v63 = vpack.c.bf16 %v1772_v15, %v1771_v31 }
 0x286   : > { %v1774_v7 = vmul.f32 %v4538_v5, %v4538_v5  ;;  %v4542_v19 = vpop.f32.mrb[33].mxu0  ;;  %3613 = vmatpush3.bf16.msra.mxu1 %v3612_v43 }
 0x287   : > { %v3614_v25 = vpack.c.bf16 %v4538_v5, %v4542_v19  ;;  %v1773_v37 = vmul.f32 %v4542_v19, %v4542_v19 }
 0x289   : > { %v4548_v57 = vpop.f32.mrb[34].mxu0  ;;  %3615 = vmatprep.subr.bf16.mxu1 %v3614_v25  ;;  %v3646_v51 = vpack.c.bf16 %v1774_v7, %v1773_v37 }
 0x28a   : > { %v1776_v16 = vmul.f32 %v4548_v57, %v4548_v57  ;;  %v4552_v15 = vpop.f32.mrb[35].mxu0  ;;  %3617 = vmatpush3.bf16.msra.mxu1 %v3616_v49 }
 0x28b   : > { %v3618_v31 = vpack.c.bf16 %v4548_v57, %v4552_v15  ;;  %v1775_v43 = vmul.f32 %v4552_v15, %v4552_v15 }
 0x28d   : > { %v4558_v45 = vpop.f32.mrb[36].mxu0  ;;  %3619 = vmatprep.subr.bf16.mxu1 %v3618_v31  ;;  %v3650_v39 = vpack.c.bf16 %v1776_v16, %v1775_v43 }
 0x28e   : > { %v1778_v25 = vmul.f32 %v4558_v45, %v4558_v45  ;;  %v4562_v7 = vpop.f32.mrb[37].mxu0  ;;  %3621 = vmatpush3.bf16.msra.mxu1 %v3620_v55 }
 0x28f   : > { %v3622_v49 = vpack.c.bf16 %v4558_v45, %v4562_v7  ;;  %v1777_v37 = vmul.f32 %v4562_v7, %v4562_v7 }
 0x291   : > { %v4571_v33 = vpop.f32.mrb[38].mxu0  ;;  %3623 = vmatprep.subr.bf16.mxu1 %v3622_v49  ;;  %v3654_v31 = vpack.c.bf16 %v1778_v25, %v1777_v37  ;;  %v5046_v25 = vpack.c.bf16 %v4479_v0, %v4485_v2  ;;  %v1673_v49 = vld [vmem:[%s5041_s3] sm:$0xff]  ;;  %v5049_v37 = vpack.c.bf16 %v4403_v35, %v4411_v38 }
 0x292   : > { %v1780_v16 = vmul.f32 %v4571_v33, %v4571_v33  ;;  %v4575_v43 = vpop.f32.mrb[39].mxu0  ;;  %3625 = vmatpush3.bf16.msra.mxu1 %v3624_v61  ;;  %v5047_v61 = vpack.c.bf16 %v4371_v23, %v4379_v26  ;;  %v5051_v23 = vpack.c.bf16 %v4435_v47, %v4443_v50  ;;  %v5053_v26 = vpack.c.bf16 %v4467_v59, %v4475_v62 }
 0x293   : > { %v3626_v55 = vpack.c.bf16 %v4571_v33, %v4575_v43  ;;  %v1779_v27 = vmul.f32 %v4575_v43, %v4575_v43 }
 0x295   : > { %v3658_v3 = vpack.c.bf16 %v1780_v16, %v1779_v27  ;;  %3627 = vmatprep.subr.bf16.mxu1 %v3626_v55  ;;  %v5048_v27 = vpack.c.bf16 %v4387_v29, %v4395_v32  ;;  %v5054_v29 = vpack.c.bf16 %v4483_v1, %v4491_v4  ;;  %v4632_v55 = vld [vmem:[%s5042_s4 + $0x10] sm:$0xff] }
 0x296   : > { %3629 = vmatpush3.bf16.msra.mxu1 %v5046_v25  ;;  %v1866_v25 = vld [vmem:[%s5042_s4 + $0x18] sm:$0xff] }
 0x297   : > { %3631 = vmatprep.subr.bf16.mxu1 %v3630_v12  ;;  %v5050_v12 = vpack.c.bf16 %v4419_v41, %v4427_v44 }
 0x299   : > { %1740 = vmatmul.mubr.f32.vlgmr.msra.gmra.mrb[16].mxu1 %v1673_v49 }
 0x29a   : > { %3633 = vmatpush3.bf16.msra.mxu1 %v5047_v61  ;;  %1845 = vmatprep.mubr.f32.mxu1 %v4364_v21  ;;  %v5052_v21 = vpack.c.bf16 %v4451_v53, %v4459_v56  ;;  %v1868_v61 = vld [vmem:[%s5042_s4 + $0x28] sm:$0xff] }
 0x29b   : > { %3635 = vmatprep.subr.bf16.mxu1 %v3634_v18 }
 0x29e   : > { %3637 = vmatpush3.bf16.msra.mxu1 %v5048_v27  ;;  %v1869_v27 = vld [vmem:[%s5042_s4 + $0x30] sm:$0xff] }
 0x29f   : > { %3639 = vmatprep.subr.bf16.mxu1 %v3638_v10 }
 0x2a2   : > { %3641 = vmatpush3.bf16.msra.mxu1 %v5049_v37  ;;  %v1870_v37 = vld [vmem:[%s5042_s4 + $0x38] sm:$0xff] }
 0x2a3   : > { %3643 = vmatprep.subr.bf16.mxu1 %v3642_v63 }
 0x2a6   : > { %3645 = vmatpush3.bf16.msra.mxu1 %v5050_v12  ;;  %v1871_v12 = vld [vmem:[%s5042_s4 + $0x40] sm:$0xff] }
 0x2a7   : > { %3647 = vmatprep.subr.bf16.mxu1 %v3646_v51  ;;  %v4620_v51 = vld [vmem:[%s5042_s4] sm:$0xff] }
 0x2aa   : > { %3649 = vmatpush3.bf16.msra.mxu1 %v5051_v23  ;;  %v1872_v23 = vld [vmem:[%s5042_s4 + $0x48] sm:$0xff] }
 0x2ab   : > { %3651 = vmatprep.subr.bf16.mxu1 %v3650_v39 }
 0x2ae   : > { %3653 = vmatpush3.bf16.msra.mxu1 %v5052_v21  ;;  %v1873_v21 = vld [vmem:[%s5042_s4 + $0x50] sm:$0xff] }
 0x2af   : > { %3655 = vmatprep.subr.bf16.mxu1 %v3654_v31  ;;  %v4627_v31 = vld [vmem:[%s5042_s4 + $0x8] sm:$0xff] }
 0x2b2   : > { %3657 = vmatpush3.bf16.msra.mxu1 %v5053_v26  ;;  %v1874_v26 = vld [vmem:[%s5042_s4 + $0x58] sm:$0xff] }
 0x2b3   : > { %3659 = vmatprep.subr.bf16.mxu1 %v3658_v3 }
 0x2b6   : > { %3661 = vmatpush3.bf16.msra.mxu1 %v5054_v29  ;;  %v1875_v29 = vld [vmem:[%s5042_s4 + $0x60] sm:$0xff] }
 0x2b9   : > { %1846 = vmatmul.mubr.f32.vlgmr.msra.gmra.mrb[18].mxu1 %v1673_v49  ;;  %v1867_v49 = vld [vmem:[%s5042_s4 + $0x20] sm:$0xff] }
 0x2ba   : > { %3440 = vmatprep.mubr.msk.f32.mxu1 %vm1895_vm3, %v4620_v51 }
 0x36c   : > { %v3094_v32 = vpop.f32.mrb[16].mxu1 }
 0x36d   : > { %v3095_v35 = vpop.f32.mrb[17].mxu1 }
 0x36e   : > { %v3096_v38 = vadd.f32 %v3095_v35, %v3094_v32  ;;  %v1876_v32 = vld [vmem:[%s5042_s4 + $0x68] sm:$0xff]  ;;  %v1877_v35 = vld [vmem:[%s5042_s4 + $0x70] sm:$0xff] }
 0x370   : > { %v1746_v39 = vsel %vm1745_vm2, %v3096_v38, 0.0  ;;  %v1878_v38 = vld [vmem:[%s5042_s4 + $0x78] sm:$0xff] }
 0x371   : > { %1747 = vadd.xlane.f32.xlu0 %v1746_v39  ;;  %v1879_v39 = vld [vmem:[%s5042_s4 + $0x80] sm:$0xff] }
 0x38c   : > { %v3129_v41 = vpop.f32.mrb[18].mxu1 }
 0x38d   : > { %v3130_v44 = vpop.f32.mrb[19].mxu1 }
 0x38e   : > { %v3131_v47 = vadd.f32 %v3130_v44, %v3129_v41  ;;  %v1880_v41 = vld [vmem:[%s5042_s4 + $0x88] sm:$0xff]  ;;  %v1881_v44 = vld [vmem:[%s5042_s4 + $0x90] sm:$0xff] }
 0x390   : > { %v1851_v50 = vsel %vm1745_vm2, %v3131_v47, 0.0  ;;  %v1882_v47 = vld [vmem:[%s5042_s4 + $0x98] sm:$0xff] }
 0x391   : > { %1852 = vadd.xlane.f32.xlu0 %v1851_v50  ;;  %v1883_v50 = vld [vmem:[%s5042_s4 + $0xa0] sm:$0xff] }
 0x3fe   : > { %v1748_v53 = vpop.xlane.xlu0 %1747 }
 0x3ff   : > { %v1854_v56 = vmul.f32 0.0009765625, %v1748_v53  ;;  %v1884_v53 = vld [vmem:[%s5042_s4 + $0xa8] sm:$0xff] }
 0x401   : > { %v1856_v62 = vmul.f32 %v1854_v56, %v1854_v56  ;;  %v1861_v18 = vsub.f32 0.0, %v1854_v56  ;;  %v1885_v56 = vld [vmem:[%s5042_s4 + $0xb0] sm:$0xff] }
 0x41e   : > { %v1853_v59 = vpop.xlane.xlu0 %1852 }
 0x41f   : > { %v1855_v63 = vmul.f32 0.0009765625, %v1853_v59  ;;  %v1886_v59 = vld [vmem:[%s5042_s4 + $0xb8] sm:$0xff] }
 0x421   : > { %v1857_v1 = vsub.f32 %v1855_v63, %v1856_v62  ;;  %v1887_v62 = vld [vmem:[%s5042_s4 + $0xc0] sm:$0xff]  ;;  %v1888_v63 = vld [vmem:[%s5042_s4 + $0xc8] sm:$0xff] }
 0x423   : > { %v1858_v3 = vmax.f32 %v1857_v1, 0.0  ;;  %v1889_v1 = vld [vmem:[%s5042_s4 + $0xd0] sm:$0xff] }
 0x425   : > { %v1859_v4 = vadd.f32 1e-05, %v1858_v3  ;;  %v1890_v3 = vld [vmem:[%s5042_s4 + $0xd8] sm:$0xff] }
 0x427   : > { %3767 = vrsqrt.f32 %v1859_v4  ;;  %v1891_v4 = vld [vmem:[%s5042_s4 + $0xe0] sm:$0xff] }
 0x431   : > { %v3768_v10 = vpop.eup %3767 }
 0x432   : > { %3438 = vmatprep.subr.mxu1 %v3768_v10  ;;  %v1862_v16 = vmul.f32 %v3768_v10, %v1861_v18  ;;  %v1892_v18 = vld [vmem:[%s5042_s4 + $0xe8] sm:$0xff] }
 0x433   : > { %3439 = vmatpush3.msra.mxu1 %v3768_v10  ;;  %v1893_v10 = vld [vmem:[%s5042_s4 + $0xf0] sm:$0xff] }
 0x434   : > { %3441 = vmatmul.mubr.msk.f32.vlgmr.msra.gmra.mrb[20].mxu1 %vm1895_vm3, %v4627_v31  ;;  %3488 = vmatprep.subr.mxu1 %v1862_v16 }
 0x435   : > { %3489 = vmatpush3.msra.mxu1 %v1862_v16  ;;  %3443 = vmatprep.mubr.msk.f32.mxu1 %vm1895_vm3, %v4632_v55  ;;  %v1894_v16 = vld [vmem:[%s5042_s4 + $0xf8] sm:$0xff] }
 0x438   : > { %3444 = vmatmul.mubr.msk.f32.gmra.mrb[22].mxu1 %vm1895_vm3, %v1866_v25 }
 0x439   : > { %3446 = vmatprep.mubr.msk.f32.mxu1 %vm1895_vm3, %v1867_v49 }
 0x43c   : > { %3447 = vmatmul.mubr.msk.f32.gmra.mrb[24].mxu1 %vm1895_vm3, %v1868_v61 }
 0x43d   : > { %3449 = vmatprep.mubr.msk.f32.mxu1 %vm1895_vm3, %v1869_v27 }
 0x440   : > { %3450 = vmatmul.mubr.msk.f32.gmra.mrb[26].mxu1 %vm1895_vm3, %v1870_v37 }
 0x441   : > { %3452 = vmatprep.mubr.msk.f32.mxu1 %vm1895_vm3, %v1871_v12 }
 0x444   : > { %3453 = vmatmul.mubr.msk.f32.gmra.mrb[28].mxu1 %vm1895_vm3, %v1872_v23 }
 0x445   : > { %3455 = vmatprep.mubr.msk.f32.mxu1 %vm1895_vm3, %v1873_v21 }
 0x448   : > { %3456 = vmatmul.mubr.msk.f32.gmra.mrb[30].mxu1 %vm1895_vm3, %v1874_v26 }
 0x449   : > { %3458 = vmatprep.mubr.msk.f32.mxu1 %vm1895_vm3, %v1875_v29 }
 0x44c   : > { %3459 = vmatmul.mubr.msk.f32.gmra.mrb[32].mxu1 %vm1895_vm3, %v1876_v32 }
 0x44d   : > { %3461 = vmatprep.mubr.msk.f32.mxu1 %vm1895_vm3, %v1877_v35 }
 0x450   : > { %3462 = vmatmul.mubr.msk.f32.gmra.mrb[34].mxu1 %vm1895_vm3, %v1878_v38 }
 0x451   : > { %3464 = vmatprep.mubr.msk.f32.mxu1 %vm1895_vm3, %v1879_v39 }
 0x454   : > { %3465 = vmatmul.mubr.msk.f32.gmra.mrb[36].mxu1 %vm1895_vm3, %v1880_v41 }
 0x455   : > { %3467 = vmatprep.mubr.msk.f32.mxu1 %vm1895_vm3, %v1881_v44 }
 0x458   : > { %3468 = vmatmul.mubr.msk.f32.gmra.mrb[38].mxu1 %vm1895_vm3, %v1882_v47 }
 0x459   : > { %3470 = vmatprep.mubr.msk.f32.mxu1 %vm1895_vm3, %v1883_v50 }
 0x45c   : > { %3471 = vmatmul.mubr.msk.f32.gmra.mrb[40].mxu1 %vm1895_vm3, %v1884_v53 }
 0x45d   : > { %3473 = vmatprep.mubr.msk.f32.mxu1 %vm1895_vm3, %v1885_v56 }
 0x460   : > { %3474 = vmatmul.mubr.msk.f32.gmra.mrb[42].mxu1 %vm1895_vm3, %v1886_v59 }
 0x461   : > { %3476 = vmatprep.mubr.msk.f32.mxu1 %vm1895_vm3, %v1887_v62 }
 0x464   : > { %3477 = vmatmul.mubr.msk.f32.gmra.mrb[44].mxu1 %vm1895_vm3, %v1888_v63 }
 0x465   : > { %3479 = vmatprep.mubr.msk.f32.mxu1 %vm1895_vm3, %v1889_v1 }
 0x468   : > { %3480 = vmatmul.mubr.msk.f32.gmra.mrb[46].mxu1 %vm1895_vm3, %v1890_v3 }
 0x469   : > { %3482 = vmatprep.mubr.msk.f32.mxu1 %vm1895_vm3, %v1891_v4 }
 0x46c   : > { %3483 = vmatmul.mubr.msk.f32.gmra.mrb[48].mxu1 %vm1895_vm3, %v1892_v18 }
 0x46d   : > { %3485 = vmatprep.mubr.msk.f32.mxu1 %vm1895_vm3, %v1893_v10 }
 0x470   : > { %3486 = vmatmul.mubr.msk.f32.gmra.mrb[50].mxu1 %vm1895_vm3, %v1894_v16 }
 0x471   : > { %3490 = vmatprep.mubr.msk.f32.mxu1 %vm1895_vm3, %v4620_v51 }
 0x474   : > { %3491 = vmatmul.mubr.msk.f32.vlgmr.msra.gmra.mrb[52].mxu1 %vm1895_vm3, %v4627_v31 }
 0x475   : > { %3493 = vmatprep.mubr.msk.f32.mxu1 %vm1895_vm3, %v4632_v55 }
 0x478   : > { %3494 = vmatmul.mubr.msk.f32.gmra.mrb[54].mxu1 %vm1895_vm3, %v1866_v25 }
 0x479   : > { %3496 = vmatprep.mubr.msk.f32.mxu1 %vm1895_vm3, %v1867_v49 }
 0x47c   : > { %3497 = vmatmul.mubr.msk.f32.gmra.mrb[56].mxu1 %vm1895_vm3, %v1868_v61 }
 0x47d   : > { %3499 = vmatprep.mubr.msk.f32.mxu1 %vm1895_vm3, %v1869_v27 }
 0x480   : > { %3500 = vmatmul.mubr.msk.f32.gmra.mrb[58].mxu1 %vm1895_vm3, %v1870_v37 }
 0x481   : > { %3502 = vmatprep.mubr.msk.f32.mxu1 %vm1895_vm3, %v1871_v12 }
 0x484   : > { %3503 = vmatmul.mubr.msk.f32.gmra.mrb[60].mxu1 %vm1895_vm3, %v1872_v23 }
 0x485   : > { %3505 = vmatprep.mubr.msk.f32.mxu1 %vm1895_vm3, %v1873_v21 }
 0x488   : > { %3506 = vmatmul.mubr.msk.f32.gmra.mrb[62].mxu1 %vm1895_vm3, %v1874_v26 }
 0x489   : > { %3508 = vmatprep.mubr.msk.f32.mxu1 %vm1895_vm3, %v1875_v29 }
 0x48c   : > { %3509 = vmatmul.mubr.msk.f32.gmra.mrb[64].mxu1 %vm1895_vm3, %v1876_v32 }
 0x48d   : > { %3511 = vmatprep.mubr.msk.f32.mxu1 %vm1895_vm3, %v1877_v35 }
 0x490   : > { %3512 = vmatmul.mubr.msk.f32.gmra.mrb[66].mxu1 %vm1895_vm3, %v1878_v38 }
 0x491   : > { %3514 = vmatprep.mubr.msk.f32.mxu1 %vm1895_vm3, %v1879_v39 }
 0x494   : > { %3515 = vmatmul.mubr.msk.f32.gmra.mrb[68].mxu1 %vm1895_vm3, %v1880_v41 }
 0x495   : > { %3517 = vmatprep.mubr.msk.f32.mxu1 %vm1895_vm3, %v1881_v44 }
 0x498   : > { %3518 = vmatmul.mubr.msk.f32.gmra.mrb[70].mxu1 %vm1895_vm3, %v1882_v47 }
 0x499   : > { %3520 = vmatprep.mubr.msk.f32.mxu1 %vm1895_vm3, %v1883_v50 }
 0x49c   : > { %3521 = vmatmul.mubr.msk.f32.gmra.mrb[72].mxu1 %vm1895_vm3, %v1884_v53 }
 0x49d   : > { %3523 = vmatprep.mubr.msk.f32.mxu1 %vm1895_vm3, %v1885_v56 }
 0x4a0   : > { %3524 = vmatmul.mubr.msk.f32.gmra.mrb[74].mxu1 %vm1895_vm3, %v1886_v59 }
 0x4a1   : > { %3526 = vmatprep.mubr.msk.f32.mxu1 %vm1895_vm3, %v1887_v62 }
 0x4a4   : > { %3527 = vmatmul.mubr.msk.f32.gmra.mrb[76].mxu1 %vm1895_vm3, %v1888_v63 }
 0x4a5   : > { %3529 = vmatprep.mubr.msk.f32.mxu1 %vm1895_vm3, %v1889_v1 }
 0x4a8   : > { %3530 = vmatmul.mubr.msk.f32.gmra.mrb[78].mxu1 %vm1895_vm3, %v1890_v3 }
 0x4a9   : > { %3532 = vmatprep.mubr.msk.f32.mxu1 %vm1895_vm3, %v1891_v4 }
 0x4ac   : > { %3533 = vmatmul.mubr.msk.f32.gmra.mrb[80].mxu1 %vm1895_vm3, %v1892_v18 }
 0x4ad   : > { %3535 = vmatprep.mubr.msk.f32.mxu1 %vm1895_vm3, %v1893_v10 }
 0x4b0   : > { %3536 = vmatmul.mubr.msk.f32.gmra.mrb[82].mxu1 %vm1895_vm3, %v1894_v16 }
 0x507   : > { %v3442_v51 = vpop.f32.mrb[20].mxu1 }
 0x508   : > { %v4790_v31 = vmul.f32 %v3442_v51, %v4367_v22  ;;  %v2058_v55 = vpop.f32.mrb[21].mxu1 }
 0x509   : > { %v4793_v25 = vmul.f32 %v2058_v55, %v4373_v24 }
 0x50b   : > { %v3445_v49 = vpop.f32.mrb[22].mxu1 }
 0x50c   : > { %v4796_v61 = vmul.f32 %v3445_v49, %v4383_v28  ;;  %v2068_v27 = vpop.f32.mrb[23].mxu1 }
 0x50d   : > { %v4799_v37 = vmul.f32 %v2068_v27, %v4389_v30 }
 0x50f   : > { %v3448_v12 = vpop.f32.mrb[24].mxu1 }
 0x510   : > { %v4802_v23 = vmul.f32 %v3448_v12, %v4399_v34  ;;  %v2078_v21 = vpop.f32.mrb[25].mxu1 }
 0x511   : > { %v4805_v22 = vmul.f32 %v2078_v21, %v4405_v36 }
 0x513   : > { %v3451_v26 = vpop.f32.mrb[26].mxu1 }
 0x514   : > { %v4808_v24 = vmul.f32 %v3451_v26, %v4415_v40  ;;  %v2088_v29 = vpop.f32.mrb[27].mxu1 }
 0x515   : > { %v4811_v28 = vmul.f32 %v2088_v29, %v4421_v42 }
 0x517   : > { %v3454_v32 = vpop.f32.mrb[28].mxu1 }
 0x518   : > { %v4814_v30 = vmul.f32 %v3454_v32, %v4431_v46  ;;  %v2098_v35 = vpop.f32.mrb[29].mxu1 }
 0x519   : > { %v4817_v34 = vmul.f32 %v2098_v35, %v4437_v48 }
 0x51b   : > { %v3457_v38 = vpop.f32.mrb[30].mxu1 }
 0x51c   : > { %v4820_v36 = vmul.f32 %v3457_v38, %v4447_v52  ;;  %v2108_v39 = vpop.f32.mrb[31].mxu1 }
 0x51d   : > { %v4823_v40 = vmul.f32 %v2108_v39, %v4453_v54 }
 0x51f   : > { %v3460_v41 = vpop.f32.mrb[32].mxu1 }
 0x520   : > { %v4826_v42 = vmul.f32 %v3460_v41, %v4463_v58  ;;  %v2118_v44 = vpop.f32.mrb[33].mxu1 }
 0x521   : > { %v4829_v46 = vmul.f32 %v2118_v44, %v4469_v60 }
 0x523   : > { %v3463_v47 = vpop.f32.mrb[34].mxu1 }
 0x524   : > { %v4832_v48 = vmul.f32 %v3463_v47, %v4479_v0  ;;  %v2128_v50 = vpop.f32.mrb[35].mxu1 }
 0x525   : > { %v4835_v52 = vmul.f32 %v2128_v50, %v4485_v2 }
 0x527   : > { %v3466_v53 = vpop.f32.mrb[36].mxu1 }
 0x528   : > { %v4838_v54 = vmul.f32 %v3466_v53, %v4495_v6  ;;  %v2138_v56 = vpop.f32.mrb[37].mxu1 }
 0x529   : > { %v4841_v58 = vmul.f32 %v2138_v56, %v4501_v8 }
 0x52b   : > { %v3469_v59 = vpop.f32.mrb[38].mxu1 }
 0x52c   : > { %v4844_v60 = vmul.f32 %v3469_v59, %v4507_v11  ;;  %v2148_v62 = vpop.f32.mrb[39].mxu1 }
 0x52d   : > { %v4847_v0 = vmul.f32 %v2148_v62, %v4512_v14 }
 0x52f   : > { %v3472_v63 = vpop.f32.mrb[40].mxu1 }
 0x530   : > { %v4850_v2 = vmul.f32 %v3472_v63, %v4518_v17  ;;  %v2158_v1 = vpop.f32.mrb[41].mxu1 }
 0x531   : > { %v4853_v6 = vmul.f32 %v2158_v1, %v4522_v20 }
 0x533   : > { %v3475_v3 = vpop.f32.mrb[42].mxu1 }
 0x534   : > { %v4856_v8 = vmul.f32 %v3475_v3, %v4528_v9  ;;  %v2168_v4 = vpop.f32.mrb[43].mxu1 }
 0x535   : > { %v4859_v11 = vmul.f32 %v2168_v4, %v4532_v13 }
 0x537   : > { %v3478_v18 = vpop.f32.mrb[44].mxu1 }
 0x538   : > { %v4862_v14 = vmul.f32 %v3478_v18, %v4538_v5  ;;  %v2178_v17 = vpop.f32.mrb[45].mxu1 }
 0x539   : > { %v4865_v10 = vmul.f32 %v2178_v17, %v4542_v19 }
 0x53b   : > { %v3481_v20 = vpop.f32.mrb[46].mxu1 }
 0x53c   : > { %v4868_v16 = vmul.f32 %v3481_v20, %v4548_v57  ;;  %v2188_v9 = vpop.f32.mrb[47].mxu1 }
 0x53d   : > { %v4871_v51 = vmul.f32 %v2188_v9, %v4552_v15 }
 0x53f   : > { %v3484_v55 = vpop.f32.mrb[48].mxu1 }
 0x540   : > { %v4874_v13 = vmul.f32 %v3484_v55, %v4558_v45  ;;  %v2198_v49 = vpop.f32.mrb[49].mxu1 }
 0x541   : > { %v4877_v5 = vmul.f32 %v2198_v49, %v4562_v7 }
 0x543   : > { %v3487_v27 = vpop.f32.mrb[50].mxu1 }
 0x544   : > { %v4881_v19 = vmul.f32 %v3487_v27, %v4571_v33  ;;  %v2208_v12 = vpop.f32.mrb[51].mxu1 }
 0x545   : > { %v4884_v57 = vmul.f32 %v2208_v12, %v4575_v43 }
 0x547   : > { %v3492_v15 = vpop.f32.mrb[52].mxu1 }
 0x548   : > { %v2475_v21 = vadd.f32 %v3492_v15, %v4790_v31  ;;  %v2283_v45 = vpop.f32.mrb[53].mxu1 }
 0x549   : > { %v2474_v26 = vadd.f32 %v4793_v25, %v2283_v45 }
 0x54a   : > { %v2507_v29 = vmax.f32 %v2475_v21, 0.0 }
 0x54b   : > { %v2506_v7 = vmax.f32 %v2474_v26, 0.0  ;;  %v3495_v32 = vpop.f32.mrb[54].mxu1 }
 0x54c   : > { %2539 = vst.msk [vmem:[%s4890_s12 + $0x8] sm:$0xff] %vm1745_vm2, %v2507_v29  ;;  %v2477_v33 = vadd.f32 %v3495_v32, %v4796_v61  ;;  %v2293_v43 = vpop.f32.mrb[55].mxu1 }
 0x54d   : > { %2538 = vst.msk [vmem:[%s4890_s12] sm:$0xff] %vm1745_vm2, %v2506_v7  ;;  %v2476_v31 = vadd.f32 %v4799_v37, %v2293_v43 }
 0x54e   : > { %v2509_v25 = vmax.f32 %v2477_v33, 0.0 }
 0x54f   : > { %v2508_v35 = vmax.f32 %v2476_v31, 0.0  ;;  %v3498_v38 = vpop.f32.mrb[56].mxu1 }
 0x550   : > { %2541 = vst.msk [vmem:[%s4890_s12 + $0x18] sm:$0xff] %vm1745_vm2, %v2509_v25  ;;  %v2479_v39 = vadd.f32 %v3498_v38, %v4802_v23  ;;  %v2303_v41 = vpop.f32.mrb[57].mxu1 }
 0x551   : > { %2540 = vst.msk [vmem:[%s4890_s12 + $0x10] sm:$0xff] %vm1745_vm2, %v2508_v35  ;;  %v2478_v61 = vadd.f32 %v4805_v22, %v2303_v41 }
 0x552   : > { %v2511_v44 = vmax.f32 %v2479_v39, 0.0 }
 0x553   : > { %v2510_v47 = vmax.f32 %v2478_v61, 0.0  ;;  %v3501_v50 = vpop.f32.mrb[58].mxu1 }
 0x554   : > { %2543 = vst.msk [vmem:[%s4890_s12 + $0x28] sm:$0xff] %vm1745_vm2, %v2511_v44  ;;  %v2481_v37 = vadd.f32 %v3501_v50, %v4808_v24  ;;  %v2313_v53 = vpop.f32.mrb[59].mxu1 }
 0x555   : > { %2542 = vst.msk [vmem:[%s4890_s12 + $0x20] sm:$0xff] %vm1745_vm2, %v2510_v47  ;;  %v2480_v23 = vadd.f32 %v4811_v28, %v2313_v53 }
 0x556   : > { %v2513_v56 = vmax.f32 %v2481_v37, 0.0 }
 0x557   : > { %v2512_v59 = vmax.f32 %v2480_v23, 0.0  ;;  %v3504_v62 = vpop.f32.mrb[60].mxu1 }
 0x558   : > { %2545 = vst.msk [vmem:[%s4890_s12 + $0x38] sm:$0xff] %vm1745_vm2, %v2513_v56  ;;  %v2483_v22 = vadd.f32 %v3504_v62, %v4814_v30  ;;  %v2323_v63 = vpop.f32.mrb[61].mxu1 }
 0x559   : > { %2544 = vst.msk [vmem:[%s4890_s12 + $0x30] sm:$0xff] %vm1745_vm2, %v2512_v59  ;;  %v2482_v24 = vadd.f32 %v4817_v34, %v2323_v63 }
 0x55a   : > { %v2515_v1 = vmax.f32 %v2483_v22, 0.0 }
 0x55b   : > { %v2514_v3 = vmax.f32 %v2482_v24, 0.0  ;;  %v3507_v4 = vpop.f32.mrb[62].mxu1 }
 0x55c   : > { %2547 = vst.msk [vmem:[%s4890_s12 + $0x48] sm:$0xff] %vm1745_vm2, %v2515_v1  ;;  %v2485_v28 = vadd.f32 %v3507_v4, %v4820_v36  ;;  %v2333_v18 = vpop.f32.mrb[63].mxu1 }
 0x55d   : > { %2546 = vst.msk [vmem:[%s4890_s12 + $0x40] sm:$0xff] %vm1745_vm2, %v2514_v3  ;;  %v2484_v30 = vadd.f32 %v4823_v40, %v2333_v18 }
 0x55e   : > { %v2517_v17 = vmax.f32 %v2485_v28, 0.0 }
 0x55f   : > { %v2516_v20 = vmax.f32 %v2484_v30, 0.0  ;;  %v3510_v9 = vpop.f32.mrb[64].mxu1 }
 0x560   : > { %2549 = vst.msk [vmem:[%s4890_s12 + $0x58] sm:$0xff] %vm1745_vm2, %v2517_v17  ;;  %v2487_v34 = vadd.f32 %v3510_v9, %v4826_v42  ;;  %v2343_v55 = vpop.f32.mrb[65].mxu1 }
 0x561   : > { %2548 = vst.msk [vmem:[%s4890_s12 + $0x50] sm:$0xff] %vm1745_vm2, %v2516_v20  ;;  %v2486_v36 = vadd.f32 %v4829_v46, %v2343_v55 }
 0x562   : > { %v2519_v49 = vmax.f32 %v2487_v34, 0.0 }
 0x563   : > { %v2518_v27 = vmax.f32 %v2486_v36, 0.0  ;;  %v3513_v12 = vpop.f32.mrb[66].mxu1 }
 0x564   : > { %2551 = vst.msk [vmem:[%s4890_s12 + $0x68] sm:$0xff] %vm1745_vm2, %v2519_v49  ;;  %v2489_v40 = vadd.f32 %v3513_v12, %v4832_v48  ;;  %v2353_v15 = vpop.f32.mrb[67].mxu1 }
 0x565   : > { %2550 = vst.msk [vmem:[%s4890_s12 + $0x60] sm:$0xff] %vm1745_vm2, %v2518_v27  ;;  %v2488_v42 = vadd.f32 %v4835_v52, %v2353_v15 }
 0x566   : > { %v2521_v21 = vmax.f32 %v2489_v40, 0.0 }
 0x567   : > { %v2520_v45 = vmax.f32 %v2488_v42, 0.0  ;;  %v3516_v26 = vpop.f32.mrb[68].mxu1 }
 0x568   : > { %2553 = vst.msk [vmem:[%s4890_s12 + $0x78] sm:$0xff] %vm1745_vm2, %v2521_v21  ;;  %v2491_v46 = vadd.f32 %v3516_v26, %v4838_v54  ;;  %v2363_v29 = vpop.f32.mrb[69].mxu1 }
 0x569   : > { %2552 = vst.msk [vmem:[%s4890_s12 + $0x70] sm:$0xff] %vm1745_vm2, %v2520_v45  ;;  %v2490_v48 = vadd.f32 %v4841_v58, %v2363_v29 }
 0x56a   : > { %v2523_v7 = vmax.f32 %v2491_v46, 0.0 }
 0x56b   : > { %v2522_v32 = vmax.f32 %v2490_v48, 0.0  ;;  %v3519_v33 = vpop.f32.mrb[70].mxu1 }
 0x56c   : > { %2555 = vst.msk [vmem:[%s4890_s12 + $0x88] sm:$0xff] %vm1745_vm2, %v2523_v7  ;;  %v2493_v52 = vadd.f32 %v3519_v33, %v4844_v60  ;;  %v2373_v43 = vpop.f32.mrb[71].mxu1 }
 0x56d   : > { %2554 = vst.msk [vmem:[%s4890_s12 + $0x80] sm:$0xff] %vm1745_vm2, %v2522_v32  ;;  %v2492_v54 = vadd.f32 %v4847_v0, %v2373_v43 }
 0x56e   : > { %v2525_v31 = vmax.f32 %v2493_v52, 0.0 }
 0x56f   : > { %v2524_v25 = vmax.f32 %v2492_v54, 0.0  ;;  %v3522_v35 = vpop.f32.mrb[72].mxu1 }
 0x570   : > { %2557 = vst.msk [vmem:[%s4890_s12 + $0x98] sm:$0xff] %vm1745_vm2, %v2525_v31  ;;  %v2495_v58 = vadd.f32 %v3522_v35, %v4850_v2  ;;  %v2383_v38 = vpop.f32.mrb[73].mxu1 }
 0x571   : > { %2556 = vst.msk [vmem:[%s4890_s12 + $0x90] sm:$0xff] %vm1745_vm2, %v2524_v25  ;;  %v2494_v60 = vadd.f32 %v4853_v6, %v2383_v38 }
 0x572   : > { %v2527_v39 = vmax.f32 %v2495_v58, 0.0 }
 0x573   : > { %v2526_v41 = vmax.f32 %v2494_v60, 0.0  ;;  %v3525_v61 = vpop.f32.mrb[74].mxu1 }
 0x574   : > { %2559 = vst.msk [vmem:[%s4890_s12 + $0xa8] sm:$0xff] %vm1745_vm2, %v2527_v39  ;;  %v2497_v0 = vadd.f32 %v3525_v61, %v4856_v8  ;;  %v2393_v44 = vpop.f32.mrb[75].mxu1 }
 0x575   : > { %2558 = vst.msk [vmem:[%s4890_s12 + $0xa0] sm:$0xff] %vm1745_vm2, %v2526_v41  ;;  %v2496_v2 = vadd.f32 %v4859_v11, %v2393_v44 }
 0x576   : > { %v2529_v47 = vmax.f32 %v2497_v0, 0.0 }
 0x577   : > { %v2528_v50 = vmax.f32 %v2496_v2, 0.0  ;;  %v3528_v37 = vpop.f32.mrb[76].mxu1 }
 0x578   : > { %2561 = vst.msk [vmem:[%s4890_s12 + $0xb8] sm:$0xff] %vm1745_vm2, %v2529_v47  ;;  %v2499_v6 = vadd.f32 %v3528_v37, %v4862_v14  ;;  %v2403_v53 = vpop.f32.mrb[77].mxu1 }
 0x579   : > { %2560 = vst.msk [vmem:[%s4890_s12 + $0xb0] sm:$0xff] %vm1745_vm2, %v2528_v50  ;;  %v2498_v8 = vadd.f32 %v4865_v10, %v2403_v53 }
 0x57a   : > { %v2531_v23 = vmax.f32 %v2499_v6, 0.0 }
 0x57b   : > { %v2530_v56 = vmax.f32 %v2498_v8, 0.0  ;;  %v3531_v59 = vpop.f32.mrb[78].mxu1 }
 0x57c   : > { %2563 = vst.msk [vmem:[%s4890_s12 + $0xc8] sm:$0xff] %vm1745_vm2, %v2531_v23  ;;  %v2501_v11 = vadd.f32 %v3531_v59, %v4868_v16  ;;  %v2413_v62 = vpop.f32.mrb[79].mxu1 }
 0x57d   : > { %2562 = vst.msk [vmem:[%s4890_s12 + $0xc0] sm:$0xff] %vm1745_vm2, %v2530_v56  ;;  %v2500_v14 = vadd.f32 %v4871_v51, %v2413_v62 }
 0x57e   : > { %v2533_v22 = vmax.f32 %v2501_v11, 0.0 }
 0x57f   : > { %v2532_v63 = vmax.f32 %v2500_v14, 0.0  ;;  %v3534_v24 = vpop.f32.mrb[80].mxu1 }
 0x580   : > { %2565 = vst.msk [vmem:[%s4890_s12 + $0xd8] sm:$0xff] %vm1745_vm2, %v2533_v22  ;;  %v2503_v10 = vadd.f32 %v3534_v24, %v4874_v13  ;;  %v2423_v1 = vpop.f32.mrb[81].mxu1 }
 0x581   : > { %2564 = vst.msk [vmem:[%s4890_s12 + $0xd0] sm:$0xff] %vm1745_vm2, %v2532_v63  ;;  %v2502_v16 = vadd.f32 %v4877_v5, %v2423_v1 }
 0x582   : > { %v2535_v3 = vmax.f32 %v2503_v10, 0.0 }
 0x583   : > { %v2534_v4 = vmax.f32 %v2502_v16, 0.0  ;;  %v3537_v28 = vpop.f32.mrb[82].mxu1 }
 0x584   : > { %2567 = vst.msk [vmem:[%s4890_s12 + $0xe8] sm:$0xff] %vm1745_vm2, %v2535_v3  ;;  %v2505_v51 = vadd.f32 %v3537_v28, %v4881_v19  ;;  %v2433_v18 = vpop.f32.mrb[83].mxu1 }
 0x585   : > { %2566 = vst.msk [vmem:[%s4890_s12 + $0xe0] sm:$0xff] %vm1745_vm2, %v2534_v4  ;;  %v2504_v13 = vadd.f32 %v4884_v57, %v2433_v18 }
 0x586   : > { %v2537_v30 = vmax.f32 %v2505_v51, 0.0 }
 0x587   : > { %v2536_v5 = vmax.f32 %v2504_v13, 0.0 }
 0x588   : > { %2569 = vst.msk [vmem:[%s4890_s12 + $0xf8] sm:$0xff] %vm1745_vm2, %v2537_v30 }
 0x589   : > { %2568 = vst.msk [vmem:[%s4890_s12 + $0xf0] sm:$0xff] %vm1745_vm2, %v2536_v5 }
 0x58a   : > { %3782 = shalt.err (!%p3779_p3)
}
 0x58b   : > { %s3783_s6 = scalar_lea.hbm %s4987_s17, 4096  ;;  %s3787_s9 = scalar_lea.hbm %s5043_s5, 8192 }
 0x58c   : > { %p3784_p4 = scmp.ne.s32.totalorder %s4987_s17, %s3783_s6  ;;  %p3788_p9 = scmp.lt.u32.totalorder %s4987_s17, %s5043_s5 }
 0x58d   : > { %p3789_p10 = scmp.lt.u32.totalorder %s3787_s9, %s3783_s6  ;;  %p3791_p12 = scmp.lt.u32.totalorder %s3783_s6, %s4987_s17 }
 0x58e   : > { %p3785_p7 = pnand %p3784_p4, %p3904_p5 }
 0x58f   : > { %p3790_p11 = por %p3789_p10, %p3788_p9 }
 0x590   : > { %p3786_p8 = pneg %p3785_p7 }
 0x591   : > { %p3792_p13 = por %p3791_p12, %p3790_p11 }
 0x593   : > { %p3793_p0 = pnand %p3792_p13, %p3786_p8 }
 0x595   : > { %3796 = shalt.err (!%p3793_p0)
}
 0x596   : > { %s3834_s12 = smov 128   ;;  %s3835_s13 = smov 8  }
 0x597   : > { %3726 = dma.vmem_to_hbm [thread:$0]  (%p3904_p5), %s4989_s14, 4096, %s4987_s17, %s4997_s22, %s3834_s12, %s3834_s12, %s3835_s13  }
 0x598 PF: > { %p3732_p1 = scmp.ge.s32.totalorder %s3831_s21, 2  ;;  %s2599_s15 = sand.u32 1, %s3819_s18  }
 0x599   : > { %s2600_s16 = scalar_lea.sflag [#allocation3], %s2599_s15 }
 0x59a   : > { %p3729_p2 = pnand %p3732_p1, %p3908_p6 }
 0x59c   : > { %3814 = dma.done.wait (!%p3729_p2), %s2600_s16, 4096  }
 0x59d   : > { %3816 = vsyncadd (!%p3729_p2), %s2600_s16, 4294963200  ;;  %p15_p3 = scmp.ge.s32.totalorder %s3891_s24, 4   ;;  %s5055_s18 = smov %s3823_s19 }
 0x59e   : > { %s5056_s19 = smov %s3827_s20  ;;  %s5057_s20 = smov %s3902_s27 }
 0x59f   : > { %s5058_s21 = smov %s3891_s24  ;;  %17 = sbr.rel (!%p15_p3) target bundleno = 3 (0x3), region = 79 }
 0x5a6   :  { %2605 = vsyncpa [#allocation3], 1 }
 0x5a7   :  { %2607 = vsyncpa [#allocation3 + $0x1], 1 }

</bundles_post_ra>
